<compile_context>
chip_gen: v7x
topology: tpu7x:2x2x1
jax: 0.10.0
libtpu: 0.0.40
codegen_flags: <defaults>
</compile_context>

<pallas_src>
import math

import jax
import jax.numpy as jnp
from jax.experimental import pallas as pl
from jax.experimental.pallas import tpu as pltpu

# ---- model hyper-parameters (config of BSTransformer) -----------------------
D_MODEL = 32
N_HEADS = 4
D_K = D_MODEL // N_HEADS
FF_HIDDEN = 64
N_LAYERS = 2
SEQ_LEN = 8
MAX_SEQ_LEN = 16
BATCH = 2
ITEM_VOCAB = 100
PADDING_IDX = 0
MLP_H1 = 64
MLP_H2 = 32
CTX_FEATURES = [dict(vocab_size=10, embed_dim=8), dict(vocab_size=12, embed_dim=8)]
CTX_DIM = sum(f["embed_dim"] for f in CTX_FEATURES)
MLP_IN = D_MODEL + CTX_DIM                 # 48
LN_EPS = 1e-5                              # nn.LayerNorm default
NEG_SLOPE = 0.01                           # nn.LeakyReLU default negative_slope
SCALE = 1.0 / math.sqrt(D_K)               # folded into Wq/bq at pack time
SQRT_D = math.sqrt(D_MODEL)                # folded into the embedding table at pack time

BS = BATCH * SEQ_LEN                       # 16 folded (batch, seq) rows
HBS = N_HEADS * BS                         # 64 (head, key) lanes for the score tile
LANES = 128                                # lane-dense slab / output width
assert ITEM_VOCAB + SEQ_LEN <= LANES       # one-hot gather columns fit one lane group
assert HBS <= LANES

# ---- packed layer-weight slab layout (per layer: LAYER_ROWS x 128) ----------
_QKVO_LO = 0                               # rows 0:32   -> [Wq^T*scale | Wk^T | Wv^T | Wo^T]
_FF_LO = D_MODEL                           # rows 32:64  -> [W1^T (lanes 0:64) | W2 (lanes 64:128)]
_BQKVO_ROW = 2 * D_MODEL                   # row 64      -> [bq*scale | bk | bv | bo]
_LN_ROW = _BQKVO_ROW + 1                   # row 65      -> [g1 | be1 | g2 | be2]
_BFF_ROW = _BQKVO_ROW + 2                  # row 66      -> [b1 (0:64) | b2 (64:96)]
LAYER_ROWS = 72                            # padded to a multiple of 8

# ---- packed MLP slab layout (MLP_ROWS x 128) ---------------------------------
_MW1_LO, _MW1_HI = 0, MLP_IN                                   # rows 0:48   -> W1^T (48, 64)
_MW2_LO, _MW2_HI = MLP_IN, MLP_IN + MLP_H1                     # rows 48:112 -> W2^T (64, 32)
_MW3_LO, _MW3_HI = MLP_IN + MLP_H1, MLP_IN + MLP_H1 + MLP_H2   # rows 112:144 -> W3^T (32, 128 padded)
_MB_ROW = _MW3_HI                                              # rows 144/145/146 -> b1 / b2 / b3
MLP_ROWS = 152                                                 # padded to a multiple of 8

# ---- constants slab layout (single VMEM input for all parameters/constants) ----
_TAB_BASE = 0                                          # rows 0:128   emb*sqrt(D) + PE table (lanes 0:32)
_LAYERS_BASE = LANES                                   # rows 128:272 two packed layer slabs
_MLP_BASE = _LAYERS_BASE + N_LAYERS * LAYER_ROWS       # rows 272:424 packed MLP slab
_HM_BASE = _MLP_BASE + MLP_ROWS                        # rows 424:488 head block-diag mask (HBS, D)
_SEG_BASE = _HM_BASE + HBS                             # rows 488:552 per-head segment-sum ones (HBS, HBS)
_SEL_BASE = _SEG_BASE + HBS                            # rows 552:554 last-token selector (B, BS)
CONST_ROWS = ((_SEL_BASE + BATCH + 7) // 8) * 8        # 560

# ---- per-call dynamic slab layout ------------------------------------------------
_DYN_G = 0                                             # rows 0:16   one-hot gather (ids + positions)
_DYN_MASK = BS                                         # rows 16:32  additive key mask (lanes 0:HBS)
_DYN_CTX = 2 * BS                                      # rows 32:34  ctx features (lanes 0:CTX_DIM)
DYN_ROWS = ((2 * BS + BATCH + 7) // 8) * 8             # 40

LOGITS_PAD = 128


# ---- small in-kernel helpers -------------------------------------------------
def _matmul_nt(a, b):
    # a: (M, K), b: (N, K)  ->  a @ b.T  (contraction on axis 1 of both)
    return jax.lax.dot_general(
        a, b, (((1,), (1,)), ((), ())), preferred_element_type=jnp.float32
    )


def _leaky_relu(x):
    return jnp.where(x >= 0, x, NEG_SLOPE * x)


def _layernorm(x, gamma, beta):
    mu = jnp.mean(x, axis=-1, keepdims=True)
    var = jnp.mean((x - mu) ** 2, axis=-1, keepdims=True)
    return (x - mu) * jax.lax.rsqrt(var + LN_EPS) * gamma + beta


# ---- the fused Pallas kernel --------------------------------------------------
def bst_fused_kernel(dyn_ref, const_ref, out_ref):
    # constant structure slabs (packed with the weights; never rebuilt per call)
    hm_st = const_ref[_HM_BASE:_HM_BASE + HBS, 0:D_MODEL]       # (HBS, D) head block-diag mask
    seg_ones = const_ref[_SEG_BASE:_SEG_BASE + HBS, 0:HBS]      # (HBS, HBS) per-head ones blocks
    sel = const_ref[_SEL_BASE:_SEL_BASE + BATCH, 0:BS]          # (B, BS) last-token selector

    # ---- embedding gather * sqrt(d_model) + positional encoding: ONE MXU matmul ----
    gather = dyn_ref[_DYN_G:_DYN_G + BS, :]                     # one-hot(id) + one-hot(100+pos)
    table = const_ref[_TAB_BASE:_TAB_BASE + LANES, 0:D_MODEL]   # [item_emb*sqrt(D) ; PE ; 0]
    x = jnp.dot(gather, table, preferred_element_type=jnp.float32)      # (BS, D)

    # additive key mask, head-tiled along lanes: (BS, HBS); 0 = valid same-batch key,
    # -1e9 = padded key or cross-batch entry.
    mask_bias = dyn_ref[_DYN_MASK:_DYN_MASK + BS, 0:HBS]

    # ---- N_LAYERS transformer encoder blocks ----
    for l in range(N_LAYERS):
        base = _LAYERS_BASE + l * LAYER_ROWS
        w_qkvo = const_ref[base + _QKVO_LO:base + _QKVO_LO + D_MODEL, :]     # (32, 128)
        w_ff = const_ref[base + _FF_LO:base + _FF_LO + D_MODEL, :]           # (32, 128)
        b_qkvo = const_ref[base + _BQKVO_ROW:base + _BQKVO_ROW + 1, :]       # (1, 128)
        ln_vec = const_ref[base + _LN_ROW:base + _LN_ROW + 1, :]             # (1, 128)
        b_ff = const_ref[base + _BFF_ROW:base + _BFF_ROW + 1, :]             # (1, 128)

        # fused q/k/v (+ unused 4th block) projection; 1/sqrt(d_k) already folded into Wq/bq
        qkv = jnp.dot(x, w_qkvo, preferred_element_type=jnp.float32) + b_qkvo
        q = qkv[:, 0:D_MODEL]
        k = qkv[:, D_MODEL:2 * D_MODEL]
        v = qkv[:, 2 * D_MODEL:3 * D_MODEL]

        # heads stacked along the key/lane axis: scores are (BS, H*BS) -> lane-dense softmax,
        # and the PV matmul against the block-diagonal V recombines heads for free.
        k_st = jnp.concatenate([k] * N_HEADS, axis=0) * hm_st    # (HBS, D) head-masked keys
        v_blk = jnp.concatenate([v] * N_HEADS, axis=0) * hm_st   # (HBS, D) block-diagonal values

        s = _matmul_nt(q, k_st) + mask_bias                      # (BS, HBS)
        # No max-subtraction: post-LN scores are bounded; exp(-1e9) underflows to exactly 0.
        # (A fully-padded sequence would yield 0/0 here; same degenerate case as the reference.)
        p = jnp.exp(s)
        denom = jnp.dot(p, seg_ones, preferred_element_type=jnp.float32)   # per-head sums, broadcast
        p = p * pl.reciprocal(denom, approx=True)
        attn = jnp.dot(p, v_blk, preferred_element_type=jnp.float32)       # (BS, D), heads combined

        # output projection
        attn = (jnp.dot(attn, w_qkvo[:, 3 * D_MODEL:4 * D_MODEL],
                        preferred_element_type=jnp.float32)
                + b_qkvo[:, 3 * D_MODEL:4 * D_MODEL])

        # residual + layernorm 1
        h1 = _layernorm(x + attn, ln_vec[:, 0:D_MODEL], ln_vec[:, D_MODEL:2 * D_MODEL])

        # feed-forward: linear1 -> LeakyReLU -> linear2
        ff = (jnp.dot(h1, w_ff[:, 0:FF_HIDDEN], preferred_element_type=jnp.float32)
              + b_ff[:, 0:FF_HIDDEN])
        ff = _leaky_relu(ff)
        ff = _matmul_nt(ff, w_ff[:, FF_HIDDEN:2 * FF_HIDDEN]) + b_ff[:, FF_HIDDEN:FF_HIDDEN + D_MODEL]

        # residual + layernorm 2
        x = _layernorm(h1 + ff, ln_vec[:, 2 * D_MODEL:3 * D_MODEL],
                       ln_vec[:, 3 * D_MODEL:4 * D_MODEL])

    # ---- last-token representation (selector matmul) + context + 3-layer MLP head ----
    tgt = jnp.dot(sel, x, preferred_element_type=jnp.float32)               # (B, D)
    ctx = dyn_ref[_DYN_CTX:_DYN_CTX + BATCH, 0:CTX_DIM]                     # (B, 16)

    mb = _MLP_BASE
    # split-input first layer: tgt @ W1[:32] + ctx @ W1[32:48] (avoids a lane concat)
    h = (jnp.dot(tgt, const_ref[mb + _MW1_LO:mb + _MW1_LO + D_MODEL, 0:MLP_H1],
                 preferred_element_type=jnp.float32)
         + jnp.dot(ctx, const_ref[mb + _MW1_LO + D_MODEL:mb + _MW1_HI, 0:MLP_H1],
                   preferred_element_type=jnp.float32)
         + const_ref[mb + _MB_ROW:mb + _MB_ROW + 1, 0:MLP_H1])
    h = _leaky_relu(h)
    h = (jnp.dot(h, const_ref[mb + _MW2_LO:mb + _MW2_HI, 0:MLP_H2],
                 preferred_element_type=jnp.float32)
         + const_ref[mb + _MB_ROW + 1:mb + _MB_ROW + 2, 0:MLP_H2])
    h = _leaky_relu(h)
    logits = (jnp.dot(h, const_ref[mb + _MW3_LO:mb + _MW3_HI, :],
                      preferred_element_type=jnp.float32)
              + const_ref[mb + _MB_ROW + 2:mb + _MB_ROW + 3, :])            # (B, 128) lane-dense
    out_ref[...] = logits


# ---- glue: positional encoding, parameter init & packing ---------------------
def positional_encoding(max_len, d_model):
    position = jnp.arange(max_len, dtype=jnp.float32)[:, None]
    div_term = jnp.exp(
        jnp.arange(0, d_model, 2, dtype=jnp.float32) * (-math.log(10000.0) / d_model)
    )
    pe = jnp.zeros((max_len, d_model), jnp.float32)
    pe = pe.at[:, 0::2].set(jnp.sin(position * div_term))
    pe = pe.at[:, 1::2].set(jnp.cos(position * div_term))
    return pe


def init_params(key):
    keys = iter(jax.random.split(key, 64))

    def xavier(shape):
        fan_out, fan_in = shape
        limit = math.sqrt(6.0 / (fan_in + fan_out))
        return jax.random.uniform(next(keys), shape, jnp.float32, -limit, limit)

    # NOTE: like the PyTorch reference's _init_weights, xavier re-inits the whole
    # embedding table, including the padding_idx row.
    params = {
        "item_emb": xavier((ITEM_VOCAB, D_MODEL)),
        "pe": positional_encoding(MAX_SEQ_LEN, D_MODEL),
    }
    layers = []
    for _ in range(N_LAYERS):
        layers.append(dict(
            wq=xavier((D_MODEL, D_MODEL)), bq=jnp.zeros((D_MODEL,), jnp.float32),
            wk=xavier((D_MODEL, D_MODEL)), bk=jnp.zeros((D_MODEL,), jnp.float32),
            wv=xavier((D_MODEL, D_MODEL)), bv=jnp.zeros((D_MODEL,), jnp.float32),
            wo=xavier((D_MODEL, D_MODEL)), bo=jnp.zeros((D_MODEL,), jnp.float32),
            g1=jnp.ones((D_MODEL,), jnp.float32), be1=jnp.zeros((D_MODEL,), jnp.float32),
            w1=xavier((FF_HIDDEN, D_MODEL)), b1=jnp.zeros((FF_HIDDEN,), jnp.float32),
            w2=xavier((D_MODEL, FF_HIDDEN)), b2=jnp.zeros((D_MODEL,), jnp.float32),
            g2=jnp.ones((D_MODEL,), jnp.float32), be2=jnp.zeros((D_MODEL,), jnp.float32),
        ))
    params["layers"] = layers
    params["ctx_emb"] = [xavier((f["vocab_size"], f["embed_dim"])) for f in CTX_FEATURES]
    params["mlp"] = dict(
        w1=xavier((MLP_H1, MLP_IN)), b1=jnp.zeros((MLP_H1,), jnp.float32),
        w2=xavier((MLP_H2, MLP_H1)), b2=jnp.zeros((MLP_H2,), jnp.float32),
        w3=xavier((ITEM_VOCAB, MLP_H2)), b3=jnp.zeros((ITEM_VOCAB,), jnp.float32),
    )
    return params


def _pack_layer(lp):
    slab = jnp.zeros((LAYER_ROWS, LANES), jnp.float32)
    # 1/sqrt(d_k) folded into the query projection
    slab = slab.at[_QKVO_LO:_QKVO_LO + D_MODEL, 0:D_MODEL].set(lp["wq"].T * SCALE)
    slab = slab.at[_QKVO_LO:_QKVO_LO + D_MODEL, D_MODEL:2 * D_MODEL].set(lp["wk"].T)
    slab = slab.at[_QKVO_LO:_QKVO_LO + D_MODEL, 2 * D_MODEL:3 * D_MODEL].set(lp["wv"].T)
    slab = slab.at[_QKVO_LO:_QKVO_LO + D_MODEL, 3 * D_MODEL:4 * D_MODEL].set(lp["wo"].T)
    slab = slab.at[_FF_LO:_FF_LO + D_MODEL, 0:FF_HIDDEN].set(lp["w1"].T)            # W1^T (in, out)
    slab = slab.at[_FF_LO:_FF_LO + D_MODEL, FF_HIDDEN:2 * FF_HIDDEN].set(lp["w2"])  # W2 (out, in)
    slab = slab.at[_BQKVO_ROW, 0:D_MODEL].set(lp["bq"] * SCALE)
    slab = slab.at[_BQKVO_ROW, D_MODEL:2 * D_MODEL].set(lp["bk"])
    slab = slab.at[_BQKVO_ROW, 2 * D_MODEL:3 * D_MODEL].set(lp["bv"])
    slab = slab.at[_BQKVO_ROW, 3 * D_MODEL:4 * D_MODEL].set(lp["bo"])
    slab = slab.at[_LN_ROW, 0:D_MODEL].set(lp["g1"])
    slab = slab.at[_LN_ROW, D_MODEL:2 * D_MODEL].set(lp["be1"])
    slab = slab.at[_LN_ROW, 2 * D_MODEL:3 * D_MODEL].set(lp["g2"])
    slab = slab.at[_LN_ROW, 3 * D_MODEL:4 * D_MODEL].set(lp["be2"])
    slab = slab.at[_BFF_ROW, 0:FF_HIDDEN].set(lp["b1"])
    slab = slab.at[_BFF_ROW, FF_HIDDEN:FF_HIDDEN + D_MODEL].set(lp["b2"])
    return slab


def _pack_mlp(mp):
    slab = jnp.zeros((MLP_ROWS, LANES), jnp.float32)
    slab = slab.at[_MW1_LO:_MW1_HI, 0:MLP_H1].set(mp["w1"].T)
    slab = slab.at[_MW2_LO:_MW2_HI, 0:MLP_H2].set(mp["w2"].T)
    slab = slab.at[_MW3_LO:_MW3_HI, 0:ITEM_VOCAB].set(mp["w3"].T)   # padded to 128 lanes
    slab = slab.at[_MB_ROW, 0:MLP_H1].set(mp["b1"])
    slab = slab.at[_MB_ROW + 1, 0:MLP_H2].set(mp["b2"])
    slab = slab.at[_MB_ROW + 2, 0:ITEM_VOCAB].set(mp["b3"])
    return slab


def pack_params(params):
    # embedding / positional-encoding one-hot gather table (2-D, lane-packed):
    # rows 0:100 = item_emb * sqrt(d_model), rows 100:108 = PE[0:SEQ_LEN]
    tab = jnp.zeros((LANES, D_MODEL), jnp.float32)
    tab = tab.at[0:ITEM_VOCAB].set(params["item_emb"] * SQRT_D)
    tab = tab.at[ITEM_VOCAB:ITEM_VOCAB + SEQ_LEN].set(params["pe"][:SEQ_LEN])

    # structure constants (built once, packed with the weights)
    r = jnp.arange(HBS)[:, None]
    c = jnp.arange(D_MODEL)[None, :]
    hm_st = (c // D_K == r // BS).astype(jnp.float32)                     # (HBS, D)
    i_ = jnp.arange(HBS)[:, None]
    j_ = jnp.arange(HBS)[None, :]
    seg_ones = (i_ // BS == j_ // BS).astype(jnp.float32)                 # (HBS, HBS)
    sel = (jnp.arange(BS)[None, :] ==
           (jnp.arange(BATCH)[:, None] * SEQ_LEN + SEQ_LEN - 1)).astype(jnp.float32)  # (B, BS)

    const = jnp.zeros((CONST_ROWS, LANES), jnp.float32)
    const = const.at[_TAB_BASE:_TAB_BASE + LANES, 0:D_MODEL].set(tab)
    for l, lp in enumerate(params["layers"]):
        const = const.at[_LAYERS_BASE + l * LAYER_ROWS:
                         _LAYERS_BASE + (l + 1) * LAYER_ROWS].set(_pack_layer(lp))
    const = const.at[_MLP_BASE:_MLP_BASE + MLP_ROWS].set(_pack_mlp(params["mlp"]))
    const = const.at[_HM_BASE:_HM_BASE + HBS, 0:D_MODEL].set(hm_st)
    const = const.at[_SEG_BASE:_SEG_BASE + HBS, 0:HBS].set(seg_ones)
    const = const.at[_SEL_BASE:_SEL_BASE + BATCH, 0:BS].set(sel)
    return dict(const=const, ctx_emb=params["ctx_emb"])


# ---- forward pass --------------------------------------------------------------
@jax.jit
def bst_forward(packed, x_ids, context_list):
    B, S = x_ids.shape
    assert B == BATCH and S == SEQ_LEN
    n = B * S

    # one-hot gather matrix: item-id one-hot + (shifted) position one-hot -> emb+PE in one matmul
    ids_flat = x_ids.reshape(-1).astype(jnp.int32)
    pos_flat = jnp.tile(jnp.arange(S, dtype=jnp.int32), B)
    gather = (jax.nn.one_hot(ids_flat, LANES, dtype=jnp.float32)
              + jax.nn.one_hot(pos_flat + ITEM_VOCAB, LANES, dtype=jnp.float32))      # (BS, 128)

    # additive key mask (0 = attendable, -1e9 = padded key or other batch), head-tiled along lanes
    valid = (x_ids != PADDING_IDX).reshape(1, n)
    col_b = jnp.arange(n, dtype=jnp.int32) // S
    same_batch = col_b[:, None] == col_b[None, :]
    base_mask = jnp.where(same_batch & valid, 0.0, -1e9).astype(jnp.float32)          # (BS, BS)
    mask_bias = jnp.tile(base_mask, (1, N_HEADS))                                     # (BS, HBS)
    mask_pad = jnp.pad(mask_bias, ((0, 0), (0, LANES - N_HEADS * n)))

    # tiny context-feature gathers (B rows each)
    ctx = jnp.concatenate(
        [packed["ctx_emb"][i][c] for i, c in enumerate(context_list)], axis=1
    ).astype(jnp.float32)                                                             # (B, 16)
    ctx_pad = jnp.pad(ctx, ((0, 0), (0, LANES - CTX_DIM)))

    # single per-call VMEM slab (1 DMA for all data-dependent inputs)
    dyn = jnp.concatenate(
        [gather, mask_pad, ctx_pad,
         jnp.zeros((DYN_ROWS - 2 * n - B, LANES), jnp.float32)], axis=0)

    vspec = pl.BlockSpec(memory_space=pltpu.MemorySpace.VMEM)
    logits_pad = pl.pallas_call(
        bst_fused_kernel,
        out_shape=jax.ShapeDtypeStruct((B, LOGITS_PAD), jnp.float32),
        in_specs=[vspec, vspec],
        out_specs=vspec,
    )(dyn, packed["const"])

    logits = logits_pad[:, :ITEM_VOCAB]
    targets = x_ids[:, -1]
    return logits, targets


if __name__ == "__main__":
    key = jax.random.PRNGKey(0)
    pkey, xkey, c1key, c2key = jax.random.split(key, 4)
    params = init_params(pkey)
    packed = pack_params(params)

    x_ids = jax.random.randint(xkey, (BATCH, SEQ_LEN), 1, ITEM_VOCAB, dtype=jnp.int32)
    x_ids = x_ids.at[0, :2].set(PADDING_IDX)   # some padding to exercise the attention mask
    context_list = [
        jax.random.randint(c1key, (BATCH,), 0, CTX_FEATURES[0]["vocab_size"], dtype=jnp.int32),
        jax.random.randint(c2key, (BATCH,), 0, CTX_FEATURES[1]["vocab_size"], dtype=jnp.int32),
    ]

    logits, targets = bst_forward(packed, x_ids, context_list)
    jax.block_until_ready((logits, targets))

    assert logits.shape == (BATCH, ITEM_VOCAB) and logits.dtype == jnp.float32
    assert targets.shape == (BATCH,)
    assert bool(jnp.all(jnp.isfinite(logits)))
    print("KERNEL_OK")
</pallas_src>

<mosaic_0001>
module attributes {stable_mosaic.version = 11 : i64} {
  func.func @bst_fused_kernel(%arg0: memref<40x128xf32, #tpu.memory_space<vmem>>, %arg1: memref<560x128xf32, #tpu.memory_space<vmem>>, %arg2: memref<2x128xf32, #tpu.memory_space<vmem>>) attributes {dimension_semantics = [], scalar_prefetch = 0 : i64, scratch_operands = 0 : i64, tpu.core_type = #tpu.core_type<tc>} {
    %c424 = arith.constant 424 : index
    %c0 = arith.constant 0 : index
    %0 = vector.load %arg1[%c424, %c0] : memref<560x128xf32, #tpu.memory_space<vmem>>, vector<64x32xf32>
    %c488 = arith.constant 488 : index
    %c0_0 = arith.constant 0 : index
    %1 = vector.load %arg1[%c488, %c0_0] : memref<560x128xf32, #tpu.memory_space<vmem>>, vector<64x64xf32>
    %c552 = arith.constant 552 : index
    %c0_1 = arith.constant 0 : index
    %2 = vector.load %arg1[%c552, %c0_1] : memref<560x128xf32, #tpu.memory_space<vmem>>, vector<2x16xf32>
    %c0_2 = arith.constant 0 : index
    %c0_3 = arith.constant 0 : index
    %3 = vector.load %arg0[%c0_2, %c0_3] : memref<40x128xf32, #tpu.memory_space<vmem>>, vector<16x128xf32>
    %c0_4 = arith.constant 0 : index
    %c0_5 = arith.constant 0 : index
    %4 = vector.load %arg1[%c0_4, %c0_5] : memref<560x128xf32, #tpu.memory_space<vmem>>, vector<128x32xf32>
    %cst = arith.constant dense<0.000000e+00> : vector<16x32xf32>
    %5 = tpu.matmul %3, %4, %cst {dimension_numbers = #tpu.dot_dimension_numbers<[1], [0], [0], [1], [0, 0, 1, 1], [], []>} : vector<16x128xf32>, vector<128x32xf32>, vector<16x32xf32> -> vector<16x32xf32>
    %c16 = arith.constant 16 : index
    %c0_6 = arith.constant 0 : index
    %6 = vector.load %arg0[%c16, %c0_6] : memref<40x128xf32, #tpu.memory_space<vmem>>, vector<16x64xf32>
    %c128 = arith.constant 128 : index
    %c0_7 = arith.constant 0 : index
    %7 = vector.load %arg1[%c128, %c0_7] : memref<560x128xf32, #tpu.memory_space<vmem>>, vector<32x128xf32>
    %c160 = arith.constant 160 : index
    %c0_8 = arith.constant 0 : index
    %8 = vector.load %arg1[%c160, %c0_8] : memref<560x128xf32, #tpu.memory_space<vmem>>, vector<32x128xf32>
    %c192 = arith.constant 192 : index
    %c0_9 = arith.constant 0 : index
    %9 = vector.load %arg1[%c192, %c0_9] : memref<560x128xf32, #tpu.memory_space<vmem>>, vector<1x128xf32>
    %c193 = arith.constant 193 : index
    %c0_10 = arith.constant 0 : index
    %10 = vector.load %arg1[%c193, %c0_10] : memref<560x128xf32, #tpu.memory_space<vmem>>, vector<1x128xf32>
    %c194 = arith.constant 194 : index
    %c0_11 = arith.constant 0 : index
    %11 = vector.load %arg1[%c194, %c0_11] : memref<560x128xf32, #tpu.memory_space<vmem>>, vector<1x128xf32>
    %cst_12 = arith.constant dense<0.000000e+00> : vector<16x128xf32>
    %12 = tpu.matmul %5, %7, %cst_12 {dimension_numbers = #tpu.dot_dimension_numbers<[1], [0], [0], [1], [0, 0, 1, 1], [], []>} : vector<16x32xf32>, vector<32x128xf32>, vector<16x128xf32> -> vector<16x128xf32>
    %13 = vector.broadcast %9 : vector<1x128xf32> to vector<16x128xf32>
    %14 = arith.addf %12, %13 : vector<16x128xf32>
    %15 = vector.extract_strided_slice %14 {offsets = [0, 0], sizes = [16, 32], strides = [1, 1]} : vector<16x128xf32> to vector<16x32xf32>
    %16 = vector.extract_strided_slice %14 {offsets = [0, 32], sizes = [16, 32], strides = [1, 1]} : vector<16x128xf32> to vector<16x32xf32>
    %17 = vector.extract_strided_slice %14 {offsets = [0, 64], sizes = [16, 32], strides = [1, 1]} : vector<16x128xf32> to vector<16x32xf32>
    %18 = tpu.concatenate %16, %16, %16, %16 in 0 : vector<16x32xf32>, vector<16x32xf32>, vector<16x32xf32>, vector<16x32xf32> -> vector<64x32xf32>
    %19 = arith.mulf %18, %0 : vector<64x32xf32>
    %20 = tpu.concatenate %17, %17, %17, %17 in 0 : vector<16x32xf32>, vector<16x32xf32>, vector<16x32xf32>, vector<16x32xf32> -> vector<64x32xf32>
    %21 = arith.mulf %20, %0 : vector<64x32xf32>
    %cst_13 = arith.constant dense<0.000000e+00> : vector<16x64xf32>
    %22 = tpu.matmul %15, %19, %cst_13 {dimension_numbers = #tpu.dot_dimension_numbers<[1], [1], [0], [0], [0, 0, 1, 0], [], []>} : vector<16x32xf32>, vector<64x32xf32>, vector<16x64xf32> -> vector<16x64xf32>
    %23 = arith.addf %22, %6 : vector<16x64xf32>
    %24 = math.exp %23 : vector<16x64xf32>
    %cst_14 = arith.constant dense<0.000000e+00> : vector<16x64xf32>
    %25 = tpu.matmul %24, %1, %cst_14 {dimension_numbers = #tpu.dot_dimension_numbers<[1], [0], [0], [1], [0, 0, 1, 1], [], []>} : vector<16x64xf32>, vector<64x64xf32>, vector<16x64xf32> -> vector<16x64xf32>
    %26 = tpu.reciprocal %25 {approx = true} : vector<16x64xf32> -> vector<16x64xf32>
    %27 = arith.mulf %24, %26 : vector<16x64xf32>
    %cst_15 = arith.constant dense<0.000000e+00> : vector<16x32xf32>
    %28 = tpu.matmul %27, %21, %cst_15 {dimension_numbers = #tpu.dot_dimension_numbers<[1], [0], [0], [1], [0, 0, 1, 1], [], []>} : vector<16x64xf32>, vector<64x32xf32>, vector<16x32xf32> -> vector<16x32xf32>
    %29 = vector.extract_strided_slice %7 {offsets = [0, 96], sizes = [32, 32], strides = [1, 1]} : vector<32x128xf32> to vector<32x32xf32>
    %cst_16 = arith.constant dense<0.000000e+00> : vector<16x32xf32>
    %30 = tpu.matmul %28, %29, %cst_16 {dimension_numbers = #tpu.dot_dimension_numbers<[1], [0], [0], [1], [0, 0, 1, 1], [], []>} : vector<16x32xf32>, vector<32x32xf32>, vector<16x32xf32> -> vector<16x32xf32>
    %31 = vector.extract_strided_slice %9 {offsets = [0, 96], sizes = [1, 32], strides = [1, 1]} : vector<1x128xf32> to vector<1x32xf32>
    %32 = vector.broadcast %31 : vector<1x32xf32> to vector<16x32xf32>
    %33 = arith.addf %30, %32 : vector<16x32xf32>
    %34 = arith.addf %5, %33 : vector<16x32xf32>
    %35 = vector.extract_strided_slice %10 {offsets = [0, 0], sizes = [1, 32], strides = [1, 1]} : vector<1x128xf32> to vector<1x32xf32>
    %36 = vector.extract_strided_slice %10 {offsets = [0, 32], sizes = [1, 32], strides = [1, 1]} : vector<1x128xf32> to vector<1x32xf32>
    %cst_17 = arith.constant dense<0.000000e+00> : vector<16xf32>
    %37 = vector.multi_reduction <add>, %34, %cst_17 [1] : vector<16x32xf32> to vector<16xf32>
    %38 = vector.shape_cast %37 : vector<16xf32> to vector<16x1xf32>
    %cst_18 = arith.constant 3.200000e+01 : f32
    %39 = vector.broadcast %cst_18 : f32 to vector<16x1xf32>
    %40 = arith.divf %38, %39 : vector<16x1xf32>
    %41 = vector.broadcast %40 : vector<16x1xf32> to vector<16x32xf32>
    %42 = arith.subf %34, %41 : vector<16x32xf32>
    %43 = arith.mulf %42, %42 : vector<16x32xf32>
    %cst_19 = arith.constant dense<0.000000e+00> : vector<16xf32>
    %44 = vector.multi_reduction <add>, %43, %cst_19 [1] : vector<16x32xf32> to vector<16xf32>
    %45 = vector.shape_cast %44 : vector<16xf32> to vector<16x1xf32>
    %cst_20 = arith.constant 3.200000e+01 : f32
    %46 = vector.broadcast %cst_20 : f32 to vector<16x1xf32>
    %47 = arith.divf %45, %46 : vector<16x1xf32>
    %48 = vector.broadcast %40 : vector<16x1xf32> to vector<16x32xf32>
    %49 = arith.subf %34, %48 : vector<16x32xf32>
    %cst_21 = arith.constant 9.99999974E-6 : f32
    %50 = vector.broadcast %cst_21 : f32 to vector<16x1xf32>
    %51 = arith.addf %47, %50 : vector<16x1xf32>
    %52 = math.rsqrt %51 : vector<16x1xf32>
    %53 = vector.broadcast %52 : vector<16x1xf32> to vector<16x32xf32>
    %54 = arith.mulf %49, %53 : vector<16x32xf32>
    %55 = vector.broadcast %35 : vector<1x32xf32> to vector<16x32xf32>
    %56 = arith.mulf %54, %55 : vector<16x32xf32>
    %57 = vector.broadcast %36 : vector<1x32xf32> to vector<16x32xf32>
    %58 = arith.addf %56, %57 : vector<16x32xf32>
    %59 = vector.extract_strided_slice %8 {offsets = [0, 0], sizes = [32, 64], strides = [1, 1]} : vector<32x128xf32> to vector<32x64xf32>
    %cst_22 = arith.constant dense<0.000000e+00> : vector<16x64xf32>
    %60 = tpu.matmul %58, %59, %cst_22 {dimension_numbers = #tpu.dot_dimension_numbers<[1], [0], [0], [1], [0, 0, 1, 1], [], []>} : vector<16x32xf32>, vector<32x64xf32>, vector<16x64xf32> -> vector<16x64xf32>
    %61 = vector.extract_strided_slice %11 {offsets = [0, 0], sizes = [1, 64], strides = [1, 1]} : vector<1x128xf32> to vector<1x64xf32>
    %62 = vector.broadcast %61 : vector<1x64xf32> to vector<16x64xf32>
    %63 = arith.addf %60, %62 : vector<16x64xf32>
    %cst_23 = arith.constant 0.000000e+00 : f32
    %64 = vector.broadcast %cst_23 : f32 to vector<16x64xf32>
    %65 = arith.cmpf oge, %63, %64 : vector<16x64xf32>
    %cst_24 = arith.constant 0.00999999977 : f32
    %66 = vector.broadcast %cst_24 : f32 to vector<16x64xf32>
    %67 = arith.mulf %66, %63 : vector<16x64xf32>
    %68 = arith.select %65, %63, %67 : vector<16x64xi1>, vector<16x64xf32>
    %69 = vector.extract_strided_slice %8 {offsets = [0, 64], sizes = [32, 64], strides = [1, 1]} : vector<32x128xf32> to vector<32x64xf32>
    %cst_25 = arith.constant dense<0.000000e+00> : vector<16x32xf32>
    %70 = tpu.matmul %68, %69, %cst_25 {dimension_numbers = #tpu.dot_dimension_numbers<[1], [1], [0], [0], [0, 0, 1, 0], [], []>} : vector<16x64xf32>, vector<32x64xf32>, vector<16x32xf32> -> vector<16x32xf32>
    %71 = vector.extract_strided_slice %11 {offsets = [0, 64], sizes = [1, 32], strides = [1, 1]} : vector<1x128xf32> to vector<1x32xf32>
    %72 = vector.broadcast %71 : vector<1x32xf32> to vector<16x32xf32>
    %73 = arith.addf %70, %72 : vector<16x32xf32>
    %74 = arith.addf %58, %73 : vector<16x32xf32>
    %75 = vector.extract_strided_slice %10 {offsets = [0, 64], sizes = [1, 32], strides = [1, 1]} : vector<1x128xf32> to vector<1x32xf32>
    %76 = vector.extract_strided_slice %10 {offsets = [0, 96], sizes = [1, 32], strides = [1, 1]} : vector<1x128xf32> to vector<1x32xf32>
    %cst_26 = arith.constant dense<0.000000e+00> : vector<16xf32>
    %77 = vector.multi_reduction <add>, %74, %cst_26 [1] : vector<16x32xf32> to vector<16xf32>
    %78 = vector.shape_cast %77 : vector<16xf32> to vector<16x1xf32>
    %cst_27 = arith.constant 3.200000e+01 : f32
    %79 = vector.broadcast %cst_27 : f32 to vector<16x1xf32>
    %80 = arith.divf %78, %79 : vector<16x1xf32>
    %81 = vector.broadcast %80 : vector<16x1xf32> to vector<16x32xf32>
    %82 = arith.subf %74, %81 : vector<16x32xf32>
    %83 = arith.mulf %82, %82 : vector<16x32xf32>
    %cst_28 = arith.constant dense<0.000000e+00> : vector<16xf32>
    %84 = vector.multi_reduction <add>, %83, %cst_28 [1] : vector<16x32xf32> to vector<16xf32>
    %85 = vector.shape_cast %84 : vector<16xf32> to vector<16x1xf32>
    %cst_29 = arith.constant 3.200000e+01 : f32
    %86 = vector.broadcast %cst_29 : f32 to vector<16x1xf32>
    %87 = arith.divf %85, %86 : vector<16x1xf32>
    %88 = vector.broadcast %80 : vector<16x1xf32> to vector<16x32xf32>
    %89 = arith.subf %74, %88 : vector<16x32xf32>
    %cst_30 = arith.constant 9.99999974E-6 : f32
    %90 = vector.broadcast %cst_30 : f32 to vector<16x1xf32>
    %91 = arith.addf %87, %90 : vector<16x1xf32>
    %92 = math.rsqrt %91 : vector<16x1xf32>
    %93 = vector.broadcast %92 : vector<16x1xf32> to vector<16x32xf32>
    %94 = arith.mulf %89, %93 : vector<16x32xf32>
    %95 = vector.broadcast %75 : vector<1x32xf32> to vector<16x32xf32>
    %96 = arith.mulf %94, %95 : vector<16x32xf32>
    %97 = vector.broadcast %76 : vector<1x32xf32> to vector<16x32xf32>
    %98 = arith.addf %96, %97 : vector<16x32xf32>
    %c200 = arith.constant 200 : index
    %c0_31 = arith.constant 0 : index
    %99 = vector.load %arg1[%c200, %c0_31] : memref<560x128xf32, #tpu.memory_space<vmem>>, vector<32x128xf32>
    %c232 = arith.constant 232 : index
    %c0_32 = arith.constant 0 : index
    %100 = vector.load %arg1[%c232, %c0_32] : memref<560x128xf32, #tpu.memory_space<vmem>>, vector<32x128xf32>
    %c264 = arith.constant 264 : index
    %c0_33 = arith.constant 0 : index
    %101 = vector.load %arg1[%c264, %c0_33] : memref<560x128xf32, #tpu.memory_space<vmem>>, vector<1x128xf32>
    %c265 = arith.constant 265 : index
    %c0_34 = arith.constant 0 : index
    %102 = vector.load %arg1[%c265, %c0_34] : memref<560x128xf32, #tpu.memory_space<vmem>>, vector<1x128xf32>
    %c266 = arith.constant 266 : index
    %c0_35 = arith.constant 0 : index
    %103 = vector.load %arg1[%c266, %c0_35] : memref<560x128xf32, #tpu.memory_space<vmem>>, vector<1x128xf32>
    %cst_36 = arith.constant dense<0.000000e+00> : vector<16x128xf32>
    %104 = tpu.matmul %98, %99, %cst_36 {dimension_numbers = #tpu.dot_dimension_numbers<[1], [0], [0], [1], [0, 0, 1, 1], [], []>} : vector<16x32xf32>, vector<32x128xf32>, vector<16x128xf32> -> vector<16x128xf32>
    %105 = vector.broadcast %101 : vector<1x128xf32> to vector<16x128xf32>
    %106 = arith.addf %104, %105 : vector<16x128xf32>
    %107 = vector.extract_strided_slice %106 {offsets = [0, 0], sizes = [16, 32], strides = [1, 1]} : vector<16x128xf32> to vector<16x32xf32>
    %108 = vector.extract_strided_slice %106 {offsets = [0, 32], sizes = [16, 32], strides = [1, 1]} : vector<16x128xf32> to vector<16x32xf32>
    %109 = vector.extract_strided_slice %106 {offsets = [0, 64], sizes = [16, 32], strides = [1, 1]} : vector<16x128xf32> to vector<16x32xf32>
    %110 = tpu.concatenate %108, %108, %108, %108 in 0 : vector<16x32xf32>, vector<16x32xf32>, vector<16x32xf32>, vector<16x32xf32> -> vector<64x32xf32>
    %111 = arith.mulf %110, %0 : vector<64x32xf32>
    %112 = tpu.concatenate %109, %109, %109, %109 in 0 : vector<16x32xf32>, vector<16x32xf32>, vector<16x32xf32>, vector<16x32xf32> -> vector<64x32xf32>
    %113 = arith.mulf %112, %0 : vector<64x32xf32>
    %cst_37 = arith.constant dense<0.000000e+00> : vector<16x64xf32>
    %114 = tpu.matmul %107, %111, %cst_37 {dimension_numbers = #tpu.dot_dimension_numbers<[1], [1], [0], [0], [0, 0, 1, 0], [], []>} : vector<16x32xf32>, vector<64x32xf32>, vector<16x64xf32> -> vector<16x64xf32>
    %115 = arith.addf %114, %6 : vector<16x64xf32>
    %116 = math.exp %115 : vector<16x64xf32>
    %cst_38 = arith.constant dense<0.000000e+00> : vector<16x64xf32>
    %117 = tpu.matmul %116, %1, %cst_38 {dimension_numbers = #tpu.dot_dimension_numbers<[1], [0], [0], [1], [0, 0, 1, 1], [], []>} : vector<16x64xf32>, vector<64x64xf32>, vector<16x64xf32> -> vector<16x64xf32>
    %118 = tpu.reciprocal %117 {approx = true} : vector<16x64xf32> -> vector<16x64xf32>
    %119 = arith.mulf %116, %118 : vector<16x64xf32>
    %cst_39 = arith.constant dense<0.000000e+00> : vector<16x32xf32>
    %120 = tpu.matmul %119, %113, %cst_39 {dimension_numbers = #tpu.dot_dimension_numbers<[1], [0], [0], [1], [0, 0, 1, 1], [], []>} : vector<16x64xf32>, vector<64x32xf32>, vector<16x32xf32> -> vector<16x32xf32>
    %121 = vector.extract_strided_slice %99 {offsets = [0, 96], sizes = [32, 32], strides = [1, 1]} : vector<32x128xf32> to vector<32x32xf32>
    %cst_40 = arith.constant dense<0.000000e+00> : vector<16x32xf32>
    %122 = tpu.matmul %120, %121, %cst_40 {dimension_numbers = #tpu.dot_dimension_numbers<[1], [0], [0], [1], [0, 0, 1, 1], [], []>} : vector<16x32xf32>, vector<32x32xf32>, vector<16x32xf32> -> vector<16x32xf32>
    %123 = vector.extract_strided_slice %101 {offsets = [0, 96], sizes = [1, 32], strides = [1, 1]} : vector<1x128xf32> to vector<1x32xf32>
    %124 = vector.broadcast %123 : vector<1x32xf32> to vector<16x32xf32>
    %125 = arith.addf %122, %124 : vector<16x32xf32>
    %126 = arith.addf %98, %125 : vector<16x32xf32>
    %127 = vector.extract_strided_slice %102 {offsets = [0, 0], sizes = [1, 32], strides = [1, 1]} : vector<1x128xf32> to vector<1x32xf32>
    %128 = vector.extract_strided_slice %102 {offsets = [0, 32], sizes = [1, 32], strides = [1, 1]} : vector<1x128xf32> to vector<1x32xf32>
    %cst_41 = arith.constant dense<0.000000e+00> : vector<16xf32>
    %129 = vector.multi_reduction <add>, %126, %cst_41 [1] : vector<16x32xf32> to vector<16xf32>
    %130 = vector.shape_cast %129 : vector<16xf32> to vector<16x1xf32>
    %cst_42 = arith.constant 3.200000e+01 : f32
    %131 = vector.broadcast %cst_42 : f32 to vector<16x1xf32>
    %132 = arith.divf %130, %131 : vector<16x1xf32>
    %133 = vector.broadcast %132 : vector<16x1xf32> to vector<16x32xf32>
    %134 = arith.subf %126, %133 : vector<16x32xf32>
    %135 = arith.mulf %134, %134 : vector<16x32xf32>
    %cst_43 = arith.constant dense<0.000000e+00> : vector<16xf32>
    %136 = vector.multi_reduction <add>, %135, %cst_43 [1] : vector<16x32xf32> to vector<16xf32>
    %137 = vector.shape_cast %136 : vector<16xf32> to vector<16x1xf32>
    %cst_44 = arith.constant 3.200000e+01 : f32
    %138 = vector.broadcast %cst_44 : f32 to vector<16x1xf32>
    %139 = arith.divf %137, %138 : vector<16x1xf32>
    %140 = vector.broadcast %132 : vector<16x1xf32> to vector<16x32xf32>
    %141 = arith.subf %126, %140 : vector<16x32xf32>
    %cst_45 = arith.constant 9.99999974E-6 : f32
    %142 = vector.broadcast %cst_45 : f32 to vector<16x1xf32>
    %143 = arith.addf %139, %142 : vector<16x1xf32>
    %144 = math.rsqrt %143 : vector<16x1xf32>
    %145 = vector.broadcast %144 : vector<16x1xf32> to vector<16x32xf32>
    %146 = arith.mulf %141, %145 : vector<16x32xf32>
    %147 = vector.broadcast %127 : vector<1x32xf32> to vector<16x32xf32>
    %148 = arith.mulf %146, %147 : vector<16x32xf32>
    %149 = vector.broadcast %128 : vector<1x32xf32> to vector<16x32xf32>
    %150 = arith.addf %148, %149 : vector<16x32xf32>
    %151 = vector.extract_strided_slice %100 {offsets = [0, 0], sizes = [32, 64], strides = [1, 1]} : vector<32x128xf32> to vector<32x64xf32>
    %cst_46 = arith.constant dense<0.000000e+00> : vector<16x64xf32>
    %152 = tpu.matmul %150, %151, %cst_46 {dimension_numbers = #tpu.dot_dimension_numbers<[1], [0], [0], [1], [0, 0, 1, 1], [], []>} : vector<16x32xf32>, vector<32x64xf32>, vector<16x64xf32> -> vector<16x64xf32>
    %153 = vector.extract_strided_slice %103 {offsets = [0, 0], sizes = [1, 64], strides = [1, 1]} : vector<1x128xf32> to vector<1x64xf32>
    %154 = vector.broadcast %153 : vector<1x64xf32> to vector<16x64xf32>
    %155 = arith.addf %152, %154 : vector<16x64xf32>
    %cst_47 = arith.constant 0.000000e+00 : f32
    %156 = vector.broadcast %cst_47 : f32 to vector<16x64xf32>
    %157 = arith.cmpf oge, %155, %156 : vector<16x64xf32>
    %cst_48 = arith.constant 0.00999999977 : f32
    %158 = vector.broadcast %cst_48 : f32 to vector<16x64xf32>
    %159 = arith.mulf %158, %155 : vector<16x64xf32>
    %160 = arith.select %157, %155, %159 : vector<16x64xi1>, vector<16x64xf32>
    %161 = vector.extract_strided_slice %100 {offsets = [0, 64], sizes = [32, 64], strides = [1, 1]} : vector<32x128xf32> to vector<32x64xf32>
    %cst_49 = arith.constant dense<0.000000e+00> : vector<16x32xf32>
    %162 = tpu.matmul %160, %161, %cst_49 {dimension_numbers = #tpu.dot_dimension_numbers<[1], [1], [0], [0], [0, 0, 1, 0], [], []>} : vector<16x64xf32>, vector<32x64xf32>, vector<16x32xf32> -> vector<16x32xf32>
    %163 = vector.extract_strided_slice %103 {offsets = [0, 64], sizes = [1, 32], strides = [1, 1]} : vector<1x128xf32> to vector<1x32xf32>
    %164 = vector.broadcast %163 : vector<1x32xf32> to vector<16x32xf32>
    %165 = arith.addf %162, %164 : vector<16x32xf32>
    %166 = arith.addf %150, %165 : vector<16x32xf32>
    %167 = vector.extract_strided_slice %102 {offsets = [0, 64], sizes = [1, 32], strides = [1, 1]} : vector<1x128xf32> to vector<1x32xf32>
    %168 = vector.extract_strided_slice %102 {offsets = [0, 96], sizes = [1, 32], strides = [1, 1]} : vector<1x128xf32> to vector<1x32xf32>
    %cst_50 = arith.constant dense<0.000000e+00> : vector<16xf32>
    %169 = vector.multi_reduction <add>, %166, %cst_50 [1] : vector<16x32xf32> to vector<16xf32>
    %170 = vector.shape_cast %169 : vector<16xf32> to vector<16x1xf32>
    %cst_51 = arith.constant 3.200000e+01 : f32
    %171 = vector.broadcast %cst_51 : f32 to vector<16x1xf32>
    %172 = arith.divf %170, %171 : vector<16x1xf32>
    %173 = vector.broadcast %172 : vector<16x1xf32> to vector<16x32xf32>
    %174 = arith.subf %166, %173 : vector<16x32xf32>
    %175 = arith.mulf %174, %174 : vector<16x32xf32>
    %cst_52 = arith.constant dense<0.000000e+00> : vector<16xf32>
    %176 = vector.multi_reduction <add>, %175, %cst_52 [1] : vector<16x32xf32> to vector<16xf32>
    %177 = vector.shape_cast %176 : vector<16xf32> to vector<16x1xf32>
    %cst_53 = arith.constant 3.200000e+01 : f32
    %178 = vector.broadcast %cst_53 : f32 to vector<16x1xf32>
    %179 = arith.divf %177, %178 : vector<16x1xf32>
    %180 = vector.broadcast %172 : vector<16x1xf32> to vector<16x32xf32>
    %181 = arith.subf %166, %180 : vector<16x32xf32>
    %cst_54 = arith.constant 9.99999974E-6 : f32
    %182 = vector.broadcast %cst_54 : f32 to vector<16x1xf32>
    %183 = arith.addf %179, %182 : vector<16x1xf32>
    %184 = math.rsqrt %183 : vector<16x1xf32>
    %185 = vector.broadcast %184 : vector<16x1xf32> to vector<16x32xf32>
    %186 = arith.mulf %181, %185 : vector<16x32xf32>
    %187 = vector.broadcast %167 : vector<1x32xf32> to vector<16x32xf32>
    %188 = arith.mulf %186, %187 : vector<16x32xf32>
    %189 = vector.broadcast %168 : vector<1x32xf32> to vector<16x32xf32>
    %190 = arith.addf %188, %189 : vector<16x32xf32>
    %cst_55 = arith.constant dense<0.000000e+00> : vector<2x32xf32>
    %191 = tpu.matmul %2, %190, %cst_55 {dimension_numbers = #tpu.dot_dimension_numbers<[1], [0], [0], [1], [0, 0, 1, 1], [], []>} : vector<2x16xf32>, vector<16x32xf32>, vector<2x32xf32> -> vector<2x32xf32>
    %c32 = arith.constant 32 : index
    %c0_56 = arith.constant 0 : index
    %192 = vector.load %arg0[%c32, %c0_56] : memref<40x128xf32, #tpu.memory_space<vmem>>, vector<2x16xf32>
    %c272 = arith.constant 272 : index
    %c0_57 = arith.constant 0 : index
    %193 = vector.load %arg1[%c272, %c0_57] : memref<560x128xf32, #tpu.memory_space<vmem>>, vector<32x64xf32>
    %cst_58 = arith.constant dense<0.000000e+00> : vector<2x64xf32>
    %194 = tpu.matmul %191, %193, %cst_58 {dimension_numbers = #tpu.dot_dimension_numbers<[1], [0], [0], [1], [0, 0, 1, 1], [], []>} : vector<2x32xf32>, vector<32x64xf32>, vector<2x64xf32> -> vector<2x64xf32>
    %c304 = arith.constant 304 : index
    %c0_59 = arith.constant 0 : index
    %195 = vector.load %arg1[%c304, %c0_59] : memref<560x128xf32, #tpu.memory_space<vmem>>, vector<16x64xf32>
    %cst_60 = arith.constant dense<0.000000e+00> : vector<2x64xf32>
    %196 = tpu.matmul %192, %195, %cst_60 {dimension_numbers = #tpu.dot_dimension_numbers<[1], [0], [0], [1], [0, 0, 1, 1], [], []>} : vector<2x16xf32>, vector<16x64xf32>, vector<2x64xf32> -> vector<2x64xf32>
    %197 = arith.addf %194, %196 : vector<2x64xf32>
    %c416 = arith.constant 416 : index
    %c0_61 = arith.constant 0 : index
    %198 = vector.load %arg1[%c416, %c0_61] : memref<560x128xf32, #tpu.memory_space<vmem>>, vector<1x64xf32>
    %199 = vector.broadcast %198 : vector<1x64xf32> to vector<2x64xf32>
    %200 = arith.addf %197, %199 : vector<2x64xf32>
    %cst_62 = arith.constant 0.000000e+00 : f32
    %201 = vector.broadcast %cst_62 : f32 to vector<2x64xf32>
    %202 = arith.cmpf oge, %200, %201 : vector<2x64xf32>
    %cst_63 = arith.constant 0.00999999977 : f32
    %203 = vector.broadcast %cst_63 : f32 to vector<2x64xf32>
    %204 = arith.mulf %203, %200 : vector<2x64xf32>
    %205 = arith.select %202, %200, %204 : vector<2x64xi1>, vector<2x64xf32>
    %c320 = arith.constant 320 : index
    %c0_64 = arith.constant 0 : index
    %206 = vector.load %arg1[%c320, %c0_64] : memref<560x128xf32, #tpu.memory_space<vmem>>, vector<64x32xf32>
    %cst_65 = arith.constant dense<0.000000e+00> : vector<2x32xf32>
    %207 = tpu.matmul %205, %206, %cst_65 {dimension_numbers = #tpu.dot_dimension_numbers<[1], [0], [0], [1], [0, 0, 1, 1], [], []>} : vector<2x64xf32>, vector<64x32xf32>, vector<2x32xf32> -> vector<2x32xf32>
    %c417 = arith.constant 417 : index
    %c0_66 = arith.constant 0 : index
    %208 = vector.load %arg1[%c417, %c0_66] : memref<560x128xf32, #tpu.memory_space<vmem>>, vector<1x32xf32>
    %209 = vector.broadcast %208 : vector<1x32xf32> to vector<2x32xf32>
    %210 = arith.addf %207, %209 : vector<2x32xf32>
    %cst_67 = arith.constant 0.000000e+00 : f32
    %211 = vector.broadcast %cst_67 : f32 to vector<2x32xf32>
    %212 = arith.cmpf oge, %210, %211 : vector<2x32xf32>
    %cst_68 = arith.constant 0.00999999977 : f32
    %213 = vector.broadcast %cst_68 : f32 to vector<2x32xf32>
    %214 = arith.mulf %213, %210 : vector<2x32xf32>
    %215 = arith.select %212, %210, %214 : vector<2x32xi1>, vector<2x32xf32>
    %c384 = arith.constant 384 : index
    %c0_69 = arith.constant 0 : index
    %216 = vector.load %arg1[%c384, %c0_69] : memref<560x128xf32, #tpu.memory_space<vmem>>, vector<32x128xf32>
    %cst_70 = arith.constant dense<0.000000e+00> : vector<2x128xf32>
    %217 = tpu.matmul %215, %216, %cst_70 {dimension_numbers = #tpu.dot_dimension_numbers<[1], [0], [0], [1], [0, 0, 1, 1], [], []>} : vector<2x32xf32>, vector<32x128xf32>, vector<2x128xf32> -> vector<2x128xf32>
    %c418 = arith.constant 418 : index
    %c0_71 = arith.constant 0 : index
    %218 = vector.load %arg1[%c418, %c0_71] : memref<560x128xf32, #tpu.memory_space<vmem>>, vector<1x128xf32>
    %219 = vector.broadcast %218 : vector<1x128xf32> to vector<2x128xf32>
    %220 = arith.addf %217, %219 : vector<2x128xf32>
    %c0_72 = arith.constant 0 : index
    %c0_73 = arith.constant 0 : index
    %221 = vector.load %arg2[%c0_72, %c0_73] : memref<2x128xf32, #tpu.memory_space<vmem>>, vector<2x128xf32>
    tpu.vector_store %arg2[%c0_72, %c0_73], %220 {strides = array<i32>} : memref<2x128xf32, #tpu.memory_space<vmem>>, vector<2x128xf32>,
    return
  }
}

</mosaic_0001>

<bundles_post_ra>
// kernel: tile.19
= control target key start
LH: loop header
LB: loop body
LE: loop exit
PB: predicated region body
PF: predicated region fallthrough
CT: control target
= control target key end

     0   :  { %vm82_vm0 = vcmask 1047556   ;;  %vm84_vm1 = vcmask 130048   ;;  %s195_s9 = smov 48   ;;  %s196_s14 = smov 16   ;;  %vm103_vm2 = vcmask 523648   ;;  %vm124_vm3 = vcmask 392448   ;;  %s289_s0 = inlined_call_operand.vmem [shape: f32[16,4,16], index: 0, kind: input, shape index: {}]   ;;  %s290_s1 = inlined_call_operand.vmem [shape: f32[16,64], index: 1, kind: output, shape index: {}]  }
   0x1   :  { %v180_v0 = vld [vmem:[%s289_s0 + $0x1c] sm:$0xf]  ;;  %v181_v1 = vld [vmem:[%s289_s0 + $0x18] sm:$0xf]  ;;  %v182_v2 = vld [vmem:[%s289_s0 + $0x14] sm:$0xf] }
   0x2   :  { %48 = vst [vmem:[#allocation0 + $0x38] sm:$0xf] %v180_v0  ;;  %53 = vst [vmem:[#allocation0 + $0x30] sm:$0xf] %v181_v1  ;;  %v183_v3 = vld [vmem:[%s289_s0 + $0x10] sm:$0xf] }
   0x3   :  { %58 = vst [vmem:[#allocation0 + $0x28] sm:$0xf] %v182_v2  ;;  %v184_v4 = vld [vmem:[%s289_s0 + $0xc] sm:$0xf]  ;;  %v185_v5 = vld [vmem:[%s289_s0 + $0x8] sm:$0xf] }
   0x4   :  { %63 = vst [vmem:[#allocation0 + $0x20] sm:$0xf] %v183_v3  ;;  %68 = vst [vmem:[#allocation0 + $0x18] sm:$0xf] %v184_v4  ;;  %v186_v6 = vld [vmem:[%s289_s0 + $0x4] sm:$0xf] }
   0x5   :  { %73 = vst [vmem:[#allocation0 + $0x10] sm:$0xf] %v185_v5  ;;  %v78_v7 = vld [vmem:[%s289_s0] sm:$0xf]  ;;  %77 = vst [vmem:[#allocation0 + $0x8] sm:$0xf] %v186_v6 }
   0x6   :  { %79 = vst [vmem:[#allocation0] sm:$0xf] %v78_v7  ;;  %v172_v8 = vld [vmem:[%s289_s0 + $0x3c] sm:$0xf]  ;;  %v173_v9 = vld [vmem:[%s289_s0 + $0x38] sm:$0xf] }
   0x7   :  { %8 = vst [vmem:[#allocation0 + $0x78] sm:$0xf] %v172_v8  ;;  %13 = vst [vmem:[#allocation0 + $0x70] sm:$0xf] %v173_v9  ;;  %v174_v10 = vld [vmem:[%s289_s0 + $0x34] sm:$0xf] }
   0x8   :  { %v175_v11 = vld [vmem:[%s289_s0 + $0x30] sm:$0xf]  ;;  %v176_v12 = vld [vmem:[%s289_s0 + $0x2c] sm:$0xf]  ;;  %18 = vst [vmem:[#allocation0 + $0x68] sm:$0xf] %v174_v10 }
   0x9   :  { %23 = vst [vmem:[#allocation0 + $0x60] sm:$0xf] %v175_v11  ;;  %28 = vst [vmem:[#allocation0 + $0x58] sm:$0xf] %v176_v12  ;;  %v177_v13 = vld [vmem:[%s289_s0 + $0x28] sm:$0xf] }
   0xa   :  { %v178_v14 = vld [vmem:[%s289_s0 + $0x24] sm:$0xf]  ;;  %v179_v15 = vld [vmem:[%s289_s0 + $0x20] sm:$0xf]  ;;  %33 = vst [vmem:[#allocation0 + $0x50] sm:$0xf] %v177_v13 }
   0xb   :  { %38 = vst [vmem:[#allocation0 + $0x48] sm:$0xf] %v178_v14  ;;  %43 = vst [vmem:[#allocation0 + $0x40] sm:$0xf] %v179_v15  ;;  %s194_s0 = smov 32   ;;  %vm145_vm4 = vcmask 261248  }
   0xc   :  { %v119_v16 = vld [vmem:[#allocation0 + $0x2] ss:$8 sm:$0xf0]   ;;  %v98_v17 = vld [vmem:[#allocation0 + $0x3] ss:$8 sm:$0xf0]  }
   0xd   :  { %v117_v18 = vld [vmem:[#allocation0 + $0x2] ss:$8 sm:$0xf]   ;;  %v96_v19 = vld [vmem:[#allocation0 + $0x3] ss:$8 sm:$0xf]  }
   0xe   :  { %v121_v20 = vsel %vm82_vm0, %v119_v16, %v117_v18  ;;  %v100_v21 = vsel %vm82_vm0, %v98_v17, %v96_v19  ;;  %v138_v24 = vld [vmem:[#allocation0 + $0x1] ss:$8 sm:$0xf]   ;;  %v80_v32 = vld [vmem:[#allocation0] ss:$8 sm:$0xf]  }
   0xf   :  { %122 = vrot.lane.b32.xlu1 %v121_v20, %s194_s0  ;;  %101 = vrot.lane.b32.xlu0 %v100_v21, %s195_s9  ;;  %v140_v25 = vld [vmem:[#allocation0 + $0x1] ss:$8 sm:$0xf0]   ;;  %v81_v33 = vld [vmem:[#allocation0] ss:$8 sm:$0xf0]  }
  0x10   :  { %v129_v22 = vld [vmem:[#allocation0 + $0x42] ss:$8 sm:$0xf0]   ;;  %v108_v23 = vld [vmem:[#allocation0 + $0x43] ss:$8 sm:$0xf0]   ;;  %v83_v34 = vsel %vm82_vm0, %v81_v33, %v80_v32  ;;  %v142_v38 = vsel %vm82_vm0, %v140_v25, %v138_v24 }
  0x11   :  { %v150_v31 = vld [vmem:[#allocation0 + $0x41] ss:$8 sm:$0xf0]   ;;  %v89_v36 = vld [vmem:[#allocation0 + $0x40] ss:$8 sm:$0xf0]  }
  0x12   :  { %v127_v26 = vld [vmem:[#allocation0 + $0x42] ss:$8 sm:$0xf]   ;;  %v106_v27 = vld [vmem:[#allocation0 + $0x43] ss:$8 sm:$0xf]  }
  0x13   :  { %v131_v28 = vsel %vm82_vm0, %v129_v22, %v127_v26  ;;  %v110_v29 = vsel %vm82_vm0, %v108_v23, %v106_v27  ;;  %v148_v30 = vld [vmem:[#allocation0 + $0x41] ss:$8 sm:$0xf]   ;;  %v87_v35 = vld [vmem:[#allocation0 + $0x40] ss:$8 sm:$0xf]  }
  0x14   :  { %132 = vrot.lane.b32.xlu1 %v131_v28, %s194_s0  ;;  %111 = vrot.lane.b32.xlu0 %v110_v29, %s195_s9  ;;  %v152_v37 = vsel %vm82_vm0, %v150_v31, %v148_v30  ;;  %85 = vst.msk [vmem:[%s290_s1] sm:$0xff] %vm84_vm1, %v83_v34   ;;  %v91_v39 = vsel %vm82_vm0, %v89_v36, %v87_v35 }
  0x15   :  { %187 = vst.msk [vmem:[%s290_s1 + $0x8] sm:$0xff] %vm84_vm1, %v91_v39  }
  0x18   :  { %153 = vrot.lane.b32.xlu1 %v152_v37, %s196_s14  ;;  %143 = vrot.lane.b32.xlu0 %v142_v38, %s196_s14 }
  0x81   :  { %v123_v40 = vpop.permute.xlu1 %122   ;;  %v102_v41 = vpop.permute.xlu0 %101  }
  0x82   :  { %104 = vst.msk [vmem:[%s290_s1] sm:$0xff] %vm103_vm2, %v102_v41  }
  0x83   :  { %125 = vst.msk [vmem:[%s290_s1] sm:$0xff] %vm124_vm3, %v123_v40  }
  0x86   :  { %v133_v42 = vpop.permute.xlu1 %132   ;;  %v112_v43 = vpop.permute.xlu0 %111  }
  0x87   :  { %188 = vst.msk [vmem:[%s290_s1 + $0x8] sm:$0xff] %vm103_vm2, %v112_v43  }
  0x88   :  { %189 = vst.msk [vmem:[%s290_s1 + $0x8] sm:$0xff] %vm124_vm3, %v133_v42  }
  0x8a   :  { %v154_v44 = vpop.permute.xlu1 %153   ;;  %v144_v45 = vpop.permute.xlu0 %143  }
  0x8b   :  { %190 = vst.msk [vmem:[%s290_s1 + $0x8] sm:$0xff] %vm145_vm4, %v154_v44   ;;  %146 = vst.msk [vmem:[%s290_s1] sm:$0xff] %vm145_vm4, %v144_v45  }

// kernel: bst_forward.1
= control target key start
LH: loop header
LB: loop body
LE: loop exit
PB: predicated region body
PF: predicated region fallthrough
CT: control target
= control target key end

     0   :  { %7 = vsyncpa [#allocation3], 0  ;;  %s3645_s0 = inlined_call_operand.vmem [shape: f32[40,128], index: 0, kind: input, shape index: {}]   ;;  %s3646_s1 = inlined_call_operand.hbm [shape: f32[560,128], index: 1, kind: input, shape index: {}]   ;;  %s3647_s2 = inlined_call_operand.hbm [shape: f32[2,128], index: 2, kind: output, shape index: {}]  }
   0x1   :  { %8 = vsyncpa [#allocation4], 0  ;;  %s3205_s9 = smov [#allocation2]   ;;  %s3157_s13 = scalar_lea.hbm %s3646_s1, 8960 }
   0x2   :  { %s16_s10 = sshll.u32 %s3205_s9, 4  ;;  %p3158_p0 = scmp.ne.s32.totalorder %s3646_s1, %s3157_s13  ;;  %s17_s10 = int_to_ptr.vmem [resolvable:$true] %s16_s10 }
   0x3   :  { %p3161_p1 = scmp.lt.u32.totalorder %s3157_s13, %s3646_s1 }
   0x5   :  { %p3163_p2 = pnand %p3161_p1, %p3158_p0 }
   0x7   :  { %3166 = shalt.err (!%p3163_p2)
}
   0x8   :  { %s3167_s18 = scalar_lea.vmem %s17_s10, 8960  ;;  %p3172_p4 = scmp.lt.s32.totalorder %s17_s10, %s17_s10 }
   0x9   :  { %p3168_p3 = scmp.ne.s32.totalorder %s17_s10, %s3167_s18  ;;  %p3173_p5 = scmp.lt.s32.totalorder %s3167_s18, %s3167_s18 }
   0xb   :  { %p3174_p6 = por %p3173_p5, %p3172_p4 }
   0xd   :  { %p3175_p7 = pnand %p3174_p6, %p3168_p3 }
   0xf   :  { %3178 = shalt.err (!%p3175_p7)
}
  0x10   :  { %s3206_s19 = smov 128   ;;  %s3207_s20 = smov 8  }
  0x11   :  { %22 = dma.hbm_to_vmem [thread:$0]  %s3646_s1, 8960, %s17_s10, [#allocation3], %s3206_s19, %s3206_s19, %s3207_s20  }
  0x12   :  { %3201 = dma.done.wait [#allocation3], 8960  }
  0x13   :  { %3202 = vsyncadd [#allocation3], 4294958336  ;;  %v45_v0 = vld [vmem:[#allocation2] sm:$0xff]  ;;  %v46_v1 = vld [vmem:[#allocation2 + $0x8] sm:$0xff]  ;;  %s3208_s26 = smov 32   ;;  %vm153_vm0 = vcmask 261120  }
  0x14   :  { %v47_v2 = vld [vmem:[#allocation2 + $0x10] sm:$0xff]  ;;  %v2749_v3 = vpack.c.bf16 %v46_v1, %v45_v0  ;;  %v48_v4 = vld [vmem:[#allocation2 + $0x18] sm:$0xff]  ;;  %v49_v6 = vld [vmem:[#allocation2 + $0x20] sm:$0xff]  ;;  %s3209_s27 = smov 96   ;;  %s3210_s28 = smov 64   ;;  %vm432_vm2 = vcmask 523264  }
  0x15   :  { %v2753_v5 = vpack.c.bf16 %v48_v4, %v47_v2  ;;  %v50_v7 = vld [vmem:[#allocation2 + $0x28] sm:$0xff]  ;;  %v51_v9 = vld [vmem:[#allocation2 + $0x30] sm:$0xff]  ;;  %v52_v10 = vld [vmem:[#allocation2 + $0x38] sm:$0xff]  ;;  %vm3212_vm8 = vmmov 0   ;;  %vm1817_vm9 = vcmask 130048  }
  0x16   :  { %2750 = vmatprep.subr.bf16.mxu0 %v2749_v3  ;;  %v2757_v8 = vpack.c.bf16 %v50_v7, %v49_v6  ;;  %v43_v11 = vld [vmem:[%s3645_s0] sm:$0xff]  ;;  %v3247_v13 = vld [vmem:[#allocation2 + $0x88] sm:$0xff]  ;;  %v3249_v14 = vld [vmem:[#allocation2 + $0x90] sm:$0xff]  ;;  %v2761_v19 = vpack.c.bf16 %v52_v10, %v51_v9 }
  0x17   :  { %2752 = vmatpush3.bf16.msra.mxu0 %v2749_v3  ;;  %2489 = vmatprep.mubr.f32.mxu0 %v43_v11  ;;  %v3245_v12 = vld [vmem:[#allocation2 + $0x80] sm:$0xff]  ;;  %v3255_v17 = vld [vmem:[#allocation2 + $0x98] sm:$0xff]  ;;  %v54_v21 = vld [vmem:[#allocation2 + $0x48] sm:$0xff] }
  0x18   :  { %2754 = vmatprep.subr.bf16.mxu0 %v2753_v5  ;;  %v3045_v15 = vpack.i.bf16 %v3247_v13, %v3245_v12  ;;  %v2781_v16 = vpack.c.bf16 %v3247_v13, %v3245_v12  ;;  %v2785_v18 = vpack.c.bf16 %v3255_v17, %v3249_v14  ;;  %v53_v20 = vld [vmem:[#allocation2 + $0x40] sm:$0xff]  ;;  %v55_v23 = vld [vmem:[#allocation2 + $0x50] sm:$0xff]  ;;  %v56_v24 = vld [vmem:[#allocation2 + $0x58] sm:$0xff] }
  0x19   :  { %v2765_v22 = vpack.c.bf16 %v54_v21, %v53_v20  ;;  %v2769_v25 = vpack.c.bf16 %v56_v24, %v55_v23  ;;  %v57_v26 = vld [vmem:[#allocation2 + $0x60] sm:$0xff]  ;;  %v58_v27 = vld [vmem:[#allocation2 + $0x68] sm:$0xff]  ;;  %v59_v29 = vld [vmem:[#allocation2 + $0x70] sm:$0xff] }
  0x1a   :  { %2782 = vmatprep.subr.bf16.mxu1 %v2781_v16  ;;  %v2773_v28 = vpack.c.bf16 %v58_v27, %v57_v26  ;;  %v60_v30 = vld [vmem:[#allocation2 + $0x78] sm:$0xff]  ;;  %v44_v32 = vld [vmem:[%s3645_s0 + $0x8] sm:$0xff]  ;;  %v29_v35 = vld [vmem:[#allocation2 + $0x1c0] sm:$0xff] }
  0x1b   :  { %2756 = vmatpush3.bf16.msra.mxu0 %v2753_v5  ;;  %2784 = vmatpush3.bf16.msra.mxu1 %v2781_v16  ;;  %v2777_v31 = vpack.c.bf16 %v60_v30, %v59_v29  ;;  %v28_v33 = vld [vmem:[#allocation2 + $0x1b8] sm:$0xff]  ;;  %v26_v34 = vld [vmem:[#allocation2 + $0x1a8] sm:$0xff]  ;;  %v27_v36 = vld [vmem:[#allocation2 + $0x1b0] sm:$0xff] }
  0x1c   :  { %2758 = vmatprep.subr.bf16.mxu0 %v2757_v8  ;;  %2786 = vmatprep.subr.bf16.mxu1 %v2785_v18  ;;  %v31_v37 = vld [vmem:[#allocation2 + $0x1d0] sm:$0xff]  ;;  %v30_v38 = vld [vmem:[#allocation2 + $0x1c8] sm:$0xff]  ;;  %v33_v39 = vld [vmem:[#allocation2 + $0x1e0] sm:$0xff] }
  0x1d   :  { %247 = vrot.lane.b32.xlu1 %v28_v33, %s3208_s26  ;;  %243 = vrot.lane.b32.xlu0 %v26_v34, %s3208_s26  ;;  %v32_v40 = vld [vmem:[#allocation2 + $0x1d8] sm:$0xff]  ;;  %v3290_v49 = vld [vmem:[#allocation2 + $0xc0] ss:$0 sm:$0xff]  ;;  %vm3334_vm1 = vmpackc.low %vm153_vm0, %vm153_vm0 }
  0x1e   :  { %v37_v12 = vld [vmem:[#allocation2 + $0x200] sm:$0xff]  ;;  %vm3449_vm3 = vmpackc.low %vm432_vm2, %vm432_vm2 }
  0x1f   :  { %2760 = vmatpush3.bf16.msra.mxu0 %v2757_v8  ;;  %2788 = vmatpush3.bf16.msra.mxu1 %v2785_v18 }
  0x20   :  { %2762 = vmatprep.subr.bf16.mxu0 %v2761_v19 }
  0x21   :  { %249 = vrot.lane.b32.xlu1 %v29_v35, %s3208_s26  ;;  %245 = vrot.lane.b32.xlu0 %v27_v36, %s3208_s26 }
  0x23   :  { %2764 = vmatpush3.bf16.msra.mxu0 %v2761_v19 }
  0x24   :  { %2766 = vmatprep.subr.bf16.mxu0 %v2765_v22 }
  0x25   :  { %253 = vrot.lane.b32.xlu1 %v31_v37, %s3208_s26  ;;  %251 = vrot.lane.b32.xlu0 %v30_v38, %s3208_s26 }
  0x27   :  { %2768 = vmatpush3.bf16.msra.mxu0 %v2765_v22 }
  0x28   :  { %2770 = vmatprep.subr.bf16.mxu0 %v2769_v25 }
  0x29   :  { %257 = vrot.lane.b32.xlu1 %v33_v39, %s3208_s26  ;;  %255 = vrot.lane.b32.xlu0 %v32_v40, %s3208_s26 }
  0x2b   :  { %2772 = vmatpush3.bf16.msra.mxu0 %v2769_v25 }
  0x2c   :  { %2774 = vmatprep.subr.bf16.mxu0 %v2773_v28 }
  0x2f   :  { %2776 = vmatpush3.bf16.msra.mxu0 %v2773_v28 }
  0x30   :  { %2778 = vmatprep.subr.bf16.mxu0 %v2777_v31 }
  0x33   :  { %2780 = vmatpush3.bf16.msra.mxu0 %v2777_v31 }
  0x36   :  { %2490 = vmatmul.mubr.f32.vlgmr.msra.gmra.mrb[0].mxu0 %v44_v32 }
  0x8f   :  { %v3278_v43 = vpop.permute.xlu1 %247  ;;  %v3280_v44 = vpop.permute.xlu0 %243 }
  0x93   :  { %v3282_v45 = vpop.permute.xlu1 %249  ;;  %v3284_v46 = vpop.permute.xlu0 %245 }
  0x97   :  { %v3286_v47 = vpop.permute.xlu1 %253  ;;  %v3288_v48 = vpop.permute.xlu0 %251 }
  0x9b   :  { %v3298_v54 = vpop.permute.xlu1 %257  ;;  %v3300_v55 = vpop.permute.xlu0 %255 }
 0x109   :  { %v3270_v41 = vpop.f32.mrb[0].mxu0 }
 0x10a   :  { %v3272_v42 = vpop.f32.mrb[1].mxu0 }
 0x10b   :  { %2500 = vmatprep.mubr.msk.f32.mxu1 %vm153_vm0, %v3272_v42 }
 0x10c   :  { %2501 = vmatmul.mubr.msk.f32.vlgmr.msra.gmra.mrb[0].mxu1 %vm153_vm0, %v3270_v41 }
 0x1df   :  { %v2502_v50 = vpop.f32.mrb[0].mxu1 }
 0x1e0   :  { %v3293_v51 = vadd.f32 %v2502_v50, %v3290_v49  ;;  %v226_v52 = vpop.f32.mrb[1].mxu1 }
 0x1e1   :  { %v3296_v53 = vadd.f32 %v3290_v49, %v226_v52 }
 0x1e2   :  { %v270_v56 = vmul.f32 %v3282_v45, %v3293_v51  ;;  %v268_v57 = vmul.f32 %v3284_v46, %v3293_v51  ;;  %v274_v60 = vmul.f32 %v3298_v54, %v3293_v51  ;;  %v272_v61 = vmul.f32 %v3286_v47, %v3293_v51 }
 0x1e3   :  { %2519 = vmatprep.mubr.msk.f32.mxu1 %vm153_vm0, %v3296_v53  ;;  %v269_v58 = vmul.f32 %v3278_v43, %v3296_v53  ;;  %v267_v59 = vmul.f32 %v3280_v44, %v3296_v53  ;;  %v273_v62 = vmul.f32 %v3300_v55, %v3296_v53  ;;  %v271_v1 = vmul.f32 %v3288_v48, %v3296_v53 }
 0x1e5   :  { %v3010_v63 = vpack.i.bf16 %v270_v56, %v269_v58  ;;  %v3005_v0 = vpack.i.bf16 %v268_v57, %v267_v59  ;;  %v3020_v2 = vpack.i.bf16 %v274_v60, %v273_v62  ;;  %v3015_v3 = vpack.i.bf16 %v272_v61, %v271_v1  ;;  %v35_v59 = vld [vmem:[#allocation2 + $0x1f0] sm:$0xff]  ;;  %v36_v61 = vld [vmem:[#allocation2 + $0x1f8] sm:$0xff] }
 0x1e6   :  { %v3402_v13 = vpack.c.bf16 %v37_v12, %v36_v61  ;;  %v40_v62 = vld [vmem:[#allocation2 + $0x218] sm:$0xff] }
 0x1e7   :  { %3011 = vrot.lane.b32.xlu1 %v3010_v63, %s3209_s27  ;;  %3006 = vrot.lane.b32.xlu0 %v3005_v0, %s3209_s27  ;;  %v41_v0 = vld [vmem:[#allocation2 + $0x220] sm:$0xff] }
 0x1eb   :  { %3016 = vrot.lane.b32.xlu0 %v3015_v3, %s3209_s27  ;;  %3021 = vrot.lane.b32.xlu1 %v3020_v2, %s3209_s27  ;;  %v3408_v3 = vpack.c.bf16 %v41_v0, %v40_v62 }
 0x1ef   :  { %275 = vrot.lane.b32.xlu0 %v26_v34, %s3210_s28  ;;  %277 = vrot.lane.b32.xlu1 %v27_v36, %s3210_s28 }
 0x1f3   :  { %279 = vrot.lane.b32.xlu0 %v28_v33, %s3210_s28  ;;  %281 = vrot.lane.b32.xlu1 %v29_v35, %s3210_s28 }
 0x1f7   :  { %283 = vrot.lane.b32.xlu0 %v30_v38, %s3210_s28  ;;  %285 = vrot.lane.b32.xlu1 %v31_v37, %s3210_s28 }
 0x1fb   :  { %287 = vrot.lane.b32.xlu0 %v32_v40, %s3210_s28  ;;  %289 = vrot.lane.b32.xlu1 %v33_v39, %s3210_s28 }
 0x259   :  { %v3012_v4 = vpop.permute.xlu1 %3011  ;;  %v3007_v5 = vpop.permute.xlu0 %3006 }
 0x25a   :  { %v3014_v6 = vunpack.i.h.bf16 %v3012_v4  ;;  %v3013_v7 = vunpack.i.l.bf16 %v3012_v4  ;;  %v3009_v8 = vunpack.i.h.bf16 %v3007_v5  ;;  %v3008_v9 = vunpack.i.l.bf16 %v3007_v5 }
 0x25c   :  { %v2789_v11 = vpack.c.bf16 %v3009_v8, %v3008_v9  ;;  %v2795_v19 = vpack.c.bf16 %v3014_v6, %v3013_v7 }
 0x25d   :  { %v3022_v16 = vpop.permute.xlu1 %3021  ;;  %v3017_v18 = vpop.permute.xlu0 %3016 }
 0x25e   :  { %2791 = vmatprep.subr.msk.bf16.mxu1 %vm3334_vm1, %v2789_v11  ;;  %v3019_v22 = vunpack.i.h.bf16 %v3017_v18  ;;  %v3018_v23 = vunpack.i.l.bf16 %v3017_v18  ;;  %v3024_v35 = vunpack.i.h.bf16 %v3022_v16  ;;  %v3023_v36 = vunpack.i.l.bf16 %v3022_v16 }
 0x25f   :  { %2794 = vmatpush3.bf16.xpose.msk.msra.mxu1 %vm3334_vm1, %v2789_v11 }
 0x260   :  { %2797 = vmatprep.subr.msk.bf16.mxu1 %vm3334_vm1, %v2795_v19  ;;  %v2801_v29 = vpack.c.bf16 %v3019_v22, %v3018_v23  ;;  %v2807_v52 = vpack.c.bf16 %v3024_v35, %v3023_v36 }
 0x261   :  { %v3344_v20 = vpop.permute.xlu1 %277  ;;  %v3346_v21 = vpop.permute.xlu0 %275 }
 0x262   :  { %v300_v24 = vmul.f32 %v3344_v20, %v3293_v51  ;;  %v299_v25 = vmul.f32 %v3346_v21, %v3296_v53 }
 0x264   :  { %v3025_v26 = vpack.i.bf16 %v300_v24, %v299_v25  ;;  %v3417_v25 = vld [vmem:[%s3645_s0 + $0x18] sm:$0xff] }
 0x265   :  { %v3352_v27 = vpop.permute.xlu1 %281  ;;  %v3354_v28 = vpop.permute.xlu0 %279 }
 0x266   :  { %v302_v30 = vmul.f32 %v3352_v27, %v3293_v51  ;;  %v301_v31 = vmul.f32 %v3354_v28, %v3296_v53  ;;  %3026 = vrot.lane.b32.xlu0 %v3025_v26, %s3210_s28  ;;  %v3422_v26 = vld [vmem:[%s3645_s0 + $0x10] sm:$0xff] }
 0x267   :  { %2800 = vmatpush3.bf16.xpose.msk.msra.mxu1 %vm3334_vm1, %v2795_v19 }
 0x268   :  { %v3030_v32 = vpack.i.bf16 %v302_v30, %v301_v31  ;;  %2803 = vmatprep.subr.msk.bf16.mxu1 %vm3334_vm1, %v2801_v29 }
 0x269   :  { %v3365_v33 = vpop.permute.xlu1 %285  ;;  %v3367_v34 = vpop.permute.xlu0 %283 }
 0x26a   :  { %v304_v37 = vmul.f32 %v3365_v33, %v3293_v51  ;;  %v303_v38 = vmul.f32 %v3367_v34, %v3296_v53  ;;  %3031 = vrot.lane.b32.xlu1 %v3030_v32, %s3210_s28 }
 0x26c   :  { %v3035_v39 = vpack.i.bf16 %v304_v37, %v303_v38 }
 0x26d   :  { %v3374_v40 = vpop.permute.xlu1 %289  ;;  %v3376_v50 = vpop.permute.xlu0 %287 }
 0x26e   :  { %v306_v56 = vmul.f32 %v3374_v40, %v3293_v51  ;;  %v305_v57 = vmul.f32 %v3376_v50, %v3296_v53  ;;  %3036 = vrot.lane.b32.xlu0 %v3035_v39, %s3210_s28  ;;  %v34_v53 = vld [vmem:[#allocation2 + $0x1e8] sm:$0xff]  ;;  %v3050_v39 = vpack.i.bf16 %v3255_v17, %v3249_v14 }
 0x26f   :  { %2806 = vmatpush3.bf16.xpose.msk.msra.mxu1 %vm3334_vm1, %v2801_v29  ;;  %v3398_v60 = vpack.c.bf16 %v35_v59, %v34_v53 }
 0x270   :  { %v3040_v58 = vpack.i.bf16 %v306_v56, %v305_v57  ;;  %2809 = vmatprep.subr.msk.bf16.mxu1 %vm3334_vm1, %v2807_v52 }
 0x271   :  { %2814 = vmatprep.subr.bf16.mxu0 %v3398_v60 }
 0x272   :  { %3041 = vrot.lane.b32.xlu1 %v3040_v58, %s3210_s28  ;;  %3046 = vrot.lane.b32.xlu0 %v3045_v15, %s3208_s26  ;;  %v38_v15 = vld [vmem:[#allocation2 + $0x208] sm:$0xff] }
 0x273   :  { %2816 = vmatpush3.bf16.msra.mxu0 %v3398_v60 }
 0x274   :  { %2818 = vmatprep.subr.bf16.mxu0 %v3402_v13 }
 0x276   :  { %648 = vrot.lane.b32.xlu0 %v3290_v49, %s3208_s26  ;;  %v39_v49 = vld [vmem:[#allocation2 + $0x210] sm:$0xff]  ;;  %3051 = vrot.lane.b32.xlu1 %v3050_v39, %s3208_s26  ;;  %v145_v39 = vld [vmem:[#allocation2 + $0xb8] sm:$0xff] }
 0x277   :  { %2812 = vmatpush3.bf16.xpose.msk.msra.mxu1 %vm3334_vm1, %v2807_v52  ;;  %2820 = vmatpush3.bf16.msra.mxu0 %v3402_v13 }
 0x27e   :  { %2520 = vmatmul.mubr.msk.f32.vlgmr.msra.gmra.mrb[2].mxu1 %vm153_vm0, %v3293_v51  ;;  %v3406_v51 = vpack.c.bf16 %v39_v49, %v38_v15 }
 0x280   :  { %2822 = vmatprep.subr.bf16.mxu0 %v3406_v51 }
 0x281   :  { %2824 = vmatpush3.bf16.msra.mxu0 %v3406_v51 }
 0x282   :  { %2826 = vmatprep.subr.bf16.mxu0 %v3408_v3 }
 0x285   :  { %2828 = vmatpush3.bf16.msra.mxu0 %v3408_v3 }
 0x2d8   :  { %v3027_v63 = vpop.permute.xlu0 %3026 }
 0x2d9   :  { %v3029_v1 = vunpack.i.h.bf16 %v3027_v63  ;;  %v3028_v2 = vunpack.i.l.bf16 %v3027_v63 }
 0x2db   :  { %v2829_v4 = vpack.c.bf16 %v3029_v1, %v3028_v2 }
 0x2dc   :  { %v3032_v5 = vpop.permute.xlu1 %3031 }
 0x2dd   :  { %v3034_v6 = vunpack.i.h.bf16 %v3032_v5  ;;  %v3033_v7 = vunpack.i.l.bf16 %v3032_v5  ;;  %2830 = vmatprep.subr.bf16.mxu1 %v2829_v4 }
 0x2de   :  { %2832 = vmatpush3.bf16.msra.mxu1 %v2829_v4 }
 0x2df   :  { %v2833_v8 = vpack.c.bf16 %v3034_v6, %v3033_v7 }
 0x2e0   :  { %v3037_v9 = vpop.permute.xlu0 %3036 }
 0x2e1   :  { %v3039_v11 = vunpack.i.h.bf16 %v3037_v9  ;;  %v3038_v16 = vunpack.i.l.bf16 %v3037_v9  ;;  %2834 = vmatprep.subr.bf16.mxu1 %v2833_v8 }
 0x2e2   :  { %2836 = vmatpush3.bf16.msra.mxu1 %v2833_v8 }
 0x2e3   :  { %v2837_v18 = vpack.c.bf16 %v3039_v11, %v3038_v16 }
 0x2e4   :  { %v3042_v19 = vpop.permute.xlu1 %3041  ;;  %v3047_v52 = vpop.permute.xlu0 %3046 }
 0x2e5   :  { %v3044_v22 = vunpack.i.h.bf16 %v3042_v19  ;;  %v3043_v23 = vunpack.i.l.bf16 %v3042_v19  ;;  %2838 = vmatprep.subr.bf16.mxu1 %v2837_v18  ;;  %v3049_v56 = vunpack.i.h.bf16 %v3047_v52  ;;  %v3048_v57 = vunpack.i.l.bf16 %v3047_v52 }
 0x2e6   :  { %2840 = vmatpush3.bf16.msra.mxu1 %v2837_v18 }
 0x2e7   :  { %v2841_v24 = vpack.c.bf16 %v3044_v22, %v3043_v23  ;;  %v2845_v58 = vpack.c.bf16 %v3049_v56, %v3048_v57 }
 0x2e8   :  { %v3052_v61 = vpop.permute.xlu1 %3051  ;;  %v649_v2 = vpop.permute.xlu0 %648 }
 0x2e9   :  { %2842 = vmatprep.subr.bf16.mxu1 %v2841_v24  ;;  %2846 = vmatprep.subr.bf16.mxu0 %v2845_v58  ;;  %v3054_v12 = vunpack.i.h.bf16 %v3052_v61  ;;  %v3053_v15 = vunpack.i.l.bf16 %v3052_v61 }
 0x2ea   :  { %2844 = vmatpush3.bf16.msra.mxu1 %v2841_v24 }
 0x2eb   :  { %v2849_v49 = vpack.c.bf16 %v3054_v12, %v3053_v15 }
 0x351   :  { %v2521_v29 = vpop.f32.mrb[2].mxu1 }
 0x352   :  { %v425_v30 = vadd.f32 %v2521_v29, %v3417_v25  ;;  %v419_v31 = vpop.f32.mrb[3].mxu1 }
 0x353   :  { %v420_v32 = vadd.f32 %v419_v31, %v3422_v26 }
 0x354   :  { %v430_v35 = vmul.f32 1.442695, %v425_v30 }
 0x355   :  { %v428_v36 = vmul.f32 1.442695, %v420_v32 }
 0x357   :  { %3125 = vpow2.f32 %v428_v36  ;;  %v3441_v36 = vld [vmem:[#allocation2 + $0xc1] ss:$0 sm:$0xff] }
 0x358   :  { %3127 = vpow2.f32 %v430_v35  ;;  %v143_v35 = vld [vmem:[#allocation2 + $0xa8] sm:$0xff] }
 0x361   :  { %v3126_v37 = vpop.eup %3125 }
 0x362   :  { %v3128_v38 = vpop.eup %3127  ;;  %2538 = vmatprep.mubr.msk.f32.mxu0 %vm432_vm2, %v3126_v37 }
 0x363   :  { %2539 = vmatmul.mubr.msk.f32.vlgmr.msra.gmra.mrb[2].mxu0 %vm432_vm2, %v3128_v38 }
 0x364   :  { %2848 = vmatpush3.bf16.msra.mxu0 %v2845_v58 }
 0x365   :  { %2850 = vmatprep.subr.bf16.mxu0 %v2849_v49 }
 0x368   :  { %2852 = vmatpush3.bf16.msra.mxu0 %v2849_v49 }
 0x436   :  { %v2540_v53 = vpop.f32.mrb[2].mxu0 }
 0x437   :  { %3129 = vrcp.f32 %v2540_v53  ;;  %v505_v59 = vpop.f32.mrb[3].mxu0 }
 0x438   :  { %3131 = vrcp.f32 %v505_v59 }
 0x441   :  { %v3130_v62 = vpop.eup %3129 }
 0x442   :  { %v3132_v14 = vpop.eup %3131  ;;  %v517_v63 = vmul.f32 %v3130_v62, %v3128_v38  ;;  %v144_v38 = vld [vmem:[#allocation2 + $0xb0] sm:$0xff] }
 0x443   :  { %v516_v17 = vmul.f32 %v3132_v14, %v3126_v37  ;;  %v2857_v52 = vpack.c.bf16 %v145_v39, %v144_v38  ;;  %v3060_v57 = vpack.i.bf16 %v145_v39, %v144_v38 }
 0x445   :  { %2557 = vmatprep.mubr.msk.f32.mxu1 %vm432_vm2, %v516_v17 }
 0x446   :  { %2558 = vmatmul.mubr.msk.f32.vlgmr.msra.gmra.mrb[4].mxu1 %vm432_vm2, %v517_v63 }
 0x519   :  { %v2559_v0 = vpop.f32.mrb[4].mxu1 }
 0x51a   :  { %v622_v1 = vpop.f32.mrb[5].mxu1 }
 0x51b   :  { %2568 = vmatprep.mubr.msk.f32.mxu0 %vm153_vm0, %v622_v1 }
 0x51c   :  { %2569 = vmatmul.mubr.msk.f32.vlgmr.msra.gmra.mrb[4].mxu0 %vm153_vm0, %v2559_v0 }
 0x5ef   :  { %v2570_v4 = vpop.f32.mrb[4].mxu0 }
 0x5f0   :  { %v729_v5 = vadd.f32 %v2570_v4, %v649_v2  ;;  %v723_v6 = vpop.f32.mrb[5].mxu0 }
 0x5f1   :  { %v724_v7 = vadd.f32 %v723_v6, %v649_v2 }
 0x5f2   :  { %v733_v8 = vadd.f32 %v3270_v41, %v729_v5 }
 0x5f3   :  { %v732_v9 = vadd.f32 %v724_v7, %v3272_v42  ;;  %v142_v42 = vld [vmem:[#allocation2 + $0xa0] sm:$0xff] }
 0x5f4   :  { %v737_v11 = vsel %vm153_vm0, %v733_v8, 0.0  ;;  %v2853_v37 = vpack.c.bf16 %v143_v35, %v142_v42  ;;  %v3055_v56 = vpack.i.bf16 %v143_v35, %v142_v42 }
 0x5f5   :  { %738 = vadd.xlane.f32.xlu0 %v737_v11  ;;  %v734_v16 = vsel %vm153_vm0, %v732_v9, 0.0 }
 0x5f6   :  { %735 = vadd.xlane.f32.xlu1 %v734_v16  ;;  %2854 = vmatprep.subr.bf16.mxu0 %v2853_v37 }
 0x5f7   :  { %2856 = vmatpush3.bf16.msra.mxu0 %v2853_v37 }
 0x5f8   :  { %2858 = vmatprep.subr.bf16.mxu0 %v2857_v52 }
 0x5fb   :  { %2860 = vmatpush3.bf16.msra.mxu0 %v2857_v52 }
 0x682   :  { %v739_v18 = vpop.xlane.xlu0 %738 }
 0x683   :  { %v742_v19 = vmul.f32 0.03125, %v739_v18  ;;  %v736_v22 = vpop.xlane.xlu1 %735 }
 0x684   :  { %v741_v23 = vmul.f32 0.03125, %v736_v22  ;;  %v2260_v22 = vld [vmem:[#allocation2 + $0xc2] ss:$0 sm:$0xff] }
 0x685   :  { %v744_v24 = vsub.f32 %v733_v8, %v742_v19 }
 0x686   :  { %v743_v29 = vsub.f32 %v732_v9, %v741_v23 }
 0x687   :  { %v746_v30 = vmul.f32 %v744_v24, %v744_v24 }
 0x688   :  { %v745_v31 = vmul.f32 %v743_v29, %v743_v29 }
 0x689   :  { %v750_v32 = vsel %vm153_vm0, %v746_v30, 0.0 }
 0x68a   :  { %751 = vadd.xlane.f32.xlu1 %v750_v32  ;;  %v747_v41 = vsel %vm153_vm0, %v745_v31, 0.0 }
 0x68b   :  { %748 = vadd.xlane.f32.xlu0 %v747_v41 }
 0x69b   :  { %3056 = vrot.lane.b32.xlu1 %v3055_v56, %s3210_s28 }
 0x69f   :  { %3061 = vrot.lane.b32.xlu1 %v3060_v57, %s3210_s28 }
 0x6a1   :  { %768 = vrot.lane.b32.xlu0 %v3441_v36, %s3209_s27 }
 0x6a5   :  { %877 = vrot.lane.b32.xlu0 %v2260_v22, %s3210_s28 }
 0x717   :  { %v752_v58 = vpop.xlane.xlu1 %751 }
 0x718   :  { %v754_v53 = vmul.f32 0.03125, %v752_v58  ;;  %v749_v59 = vpop.xlane.xlu0 %748 }
 0x719   :  { %v753_v61 = vmul.f32 0.03125, %v749_v59 }
 0x71a   :  { %v756_v12 = vadd.f32 1e-05, %v754_v53 }
 0x71b   :  { %v755_v15 = vadd.f32 1e-05, %v753_v61  ;;  %v3057_v49 = vpop.permute.xlu1 %3056 }
 0x71c   :  { %3133 = vrsqrt.f32 %v756_v12  ;;  %v3059_v62 = vunpack.i.h.bf16 %v3057_v49  ;;  %v3058_v14 = vunpack.i.l.bf16 %v3057_v49  ;;  %v769_v8 = vpop.permute.xlu0 %768 }
 0x71d   :  { %3135 = vrsqrt.f32 %v755_v15 }
 0x71e   :  { %v2861_v0 = vpack.c.bf16 %v3059_v62, %v3058_v14  ;;  %v3482_v14 = vld [vmem:[#allocation2 + $0xc8] sm:$0xff] }
 0x71f   :  { %v3062_v4 = vpop.permute.xlu1 %3061 }
 0x720   :  { %2863 = vmatprep.subr.msk.bf16.mxu1 %vm3449_vm3, %v2861_v0  ;;  %v3064_v6 = vunpack.i.h.bf16 %v3062_v4  ;;  %v3063_v7 = vunpack.i.l.bf16 %v3062_v4  ;;  %v878_v35 = vpop.permute.xlu0 %877 }
 0x721   :  { %2866 = vmatpush3.bf16.xpose.msk.msra.mxu1 %vm3449_vm3, %v2861_v0 }
 0x722   :  { %v2867_v16 = vpack.c.bf16 %v3064_v6, %v3063_v7 }
 0x724   :  { %2869 = vmatprep.subr.msk.bf16.mxu1 %vm3449_vm3, %v2867_v16 }
 0x726   :  { %v3134_v63 = vpop.eup %3133 }
 0x727   :  { %v3136_v1 = vpop.eup %3135  ;;  %v760_v2 = vmul.f32 %v3134_v63, %v744_v24  ;;  %v3484_v63 = vld [vmem:[#allocation2 + $0xd0] sm:$0xff] }
 0x728   :  { %v759_v5 = vmul.f32 %v3136_v1, %v743_v29  ;;  %v2873_v0 = vpack.c.bf16 %v3484_v63, %v3482_v14  ;;  %v3490_v1 = vld [vmem:[#allocation2 + $0xd8] sm:$0xff] }
 0x729   :  { %v766_v9 = vmul.f32 %v3441_v36, %v760_v2  ;;  %2872 = vmatpush3.bf16.xpose.msk.msra.mxu1 %vm3449_vm3, %v2867_v16  ;;  %v3492_v2 = vld [vmem:[#allocation2 + $0xe0] sm:$0xff] }
 0x72a   :  { %v765_v11 = vmul.f32 %v3441_v36, %v759_v5  ;;  %2906 = vmatprep.subr.bf16.mxu1 %v3398_v60  ;;  %2874 = vmatprep.subr.bf16.mxu0 %v2873_v0  ;;  %v2877_v4 = vpack.c.bf16 %v3492_v2, %v3490_v1 }
 0x72b   :  { %v772_v19 = vadd.f32 %v769_v8, %v766_v9 }
 0x72c   :  { %v771_v18 = vadd.f32 %v769_v8, %v765_v11 }
 0x72e   :  { %2579 = vmatprep.mubr.msk.f32.mxu0 %vm153_vm0, %v771_v18 }
 0x72f   :  { %2580 = vmatmul.mubr.msk.f32.vlgmr.msra.gmra.mrb[6].mxu0 %vm153_vm0, %v772_v19 }
 0x730   :  { %2876 = vmatpush3.bf16.msra.mxu0 %v2873_v0 }
 0x731   :  { %2878 = vmatprep.subr.bf16.mxu0 %v2877_v4 }
 0x734   :  { %2880 = vmatpush3.bf16.msra.mxu0 %v2877_v4 }
 0x802   :  { %v2581_v23 = vpop.f32.mrb[6].mxu0 }
 0x803   :  { %v855_v24 = vadd.f32 %v2581_v23, %v2260_v22  ;;  %v849_v29 = vpop.f32.mrb[7].mxu0 }
 0x804   :  { %v850_v30 = vadd.f32 %v2260_v22, %v849_v29 }
 0x805   :  { %v861_v31 = vmul.f32 0.01, %v855_v24  ;;  %vm859_vm4 = vcmp.ge.f32.partialorder %v855_v24, 0.0 }
 0x806   :  { %vm858_vm5 = vcmp.ge.f32.partialorder %v850_v30, 0.0  ;;  %v860_v32 = vmul.f32 0.01, %v850_v30 }
 0x807   :  { %v863_v42 = vsel %vm859_vm4, %v855_v24, %v861_v31 }
 0x808   :  { %v862_v41 = vsel %vm858_vm5, %v850_v30, %v860_v32  ;;  %v3504_v32 = vld [vmem:[#allocation2 + $0x108] ss:$0 sm:$0xff] }
 0x809   :  { %2590 = vmatprep.mubr.msk.f32.mxu1 %vm432_vm2, %v862_v41 }
 0x80a   :  { %2591 = vmatmul.mubr.msk.f32.vlgmr.msra.gmra.mrb[6].mxu1 %vm432_vm2, %v863_v42 }
 0x80b   :  { %2908 = vmatpush3.bf16.msra.mxu1 %v3398_v60 }
 0x80c   :  { %2910 = vmatprep.subr.bf16.mxu1 %v3402_v13 }
 0x80f   :  { %2912 = vmatpush3.bf16.msra.mxu1 %v3402_v13 }
 0x810   :  { %2914 = vmatprep.subr.bf16.mxu1 %v3406_v51 }
 0x813   :  { %2916 = vmatpush3.bf16.msra.mxu1 %v3406_v51 }
 0x814   :  { %2918 = vmatprep.subr.bf16.mxu1 %v3408_v3 }
 0x817   :  { %2920 = vmatpush3.bf16.msra.mxu1 %v3408_v3 }
 0x8dd   :  { %v2592_v37 = vpop.f32.mrb[6].mxu1 }
 0x8de   :  { %v966_v38 = vadd.f32 %v2592_v37, %v878_v35  ;;  %v960_v39 = vpop.f32.mrb[7].mxu1 }
 0x8df   :  { %v961_v52 = vadd.f32 %v960_v39, %v878_v35 }
 0x8e0   :  { %v970_v56 = vadd.f32 %v966_v38, %v772_v19 }
 0x8e1   :  { %v969_v57 = vadd.f32 %v961_v52, %v771_v18 }
 0x8e2   :  { %v974_v60 = vsel %vm153_vm0, %v970_v56, 0.0 }
 0x8e3   :  { %975 = vadd.xlane.f32.xlu0 %v974_v60  ;;  %v971_v13 = vsel %vm153_vm0, %v969_v57, 0.0 }
 0x8e4   :  { %972 = vadd.xlane.f32.xlu1 %v971_v13 }
 0x970   :  { %v976_v58 = vpop.xlane.xlu0 %975 }
 0x971   :  { %v978_v53 = vmul.f32 0.03125, %v976_v58  ;;  %v973_v51 = vpop.xlane.xlu1 %972 }
 0x972   :  { %v977_v59 = vmul.f32 0.03125, %v973_v51 }
 0x973   :  { %v980_v61 = vsub.f32 %v970_v56, %v978_v53 }
 0x974   :  { %v979_v12 = vsub.f32 %v969_v57, %v977_v59 }
 0x975   :  { %v982_v3 = vmul.f32 %v980_v61, %v980_v61 }
 0x976   :  { %v981_v15 = vmul.f32 %v979_v12, %v979_v12 }
 0x977   :  { %v986_v49 = vsel %vm153_vm0, %v982_v3, 0.0 }
 0x978   :  { %987 = vadd.xlane.f32.xlu1 %v986_v49  ;;  %v983_v62 = vsel %vm153_vm0, %v981_v15, 0.0 }
 0x979   :  { %984 = vadd.xlane.f32.xlu0 %v983_v62 }
 0x989   :  { %1002 = vrot.lane.b32.xlu1 %v3441_v36, %s3208_s26 }
 0x98f   :  { %997 = vrot.lane.b32.xlu0 %v3441_v36, %s3210_s28 }
 0xa05   :  { %v988_v5 = vpop.xlane.xlu1 %987 }
 0xa06   :  { %v990_v6 = vmul.f32 0.03125, %v988_v5  ;;  %v985_v7 = vpop.xlane.xlu0 %984 }
 0xa07   :  { %v989_v8 = vmul.f32 0.03125, %v985_v7 }
 0xa08   :  { %v992_v9 = vadd.f32 1e-05, %v990_v6 }
 0xa09   :  { %v991_v11 = vadd.f32 1e-05, %v989_v8  ;;  %v1003_v24 = vpop.permute.xlu1 %1002 }
 0xa0a   :  { %3137 = vrsqrt.f32 %v992_v9  ;;  %v998_v36 = vpop.permute.xlu0 %997 }
 0xa0b   :  { %3139 = vrsqrt.f32 %v991_v11 }
 0xa14   :  { %v3138_v16 = vpop.eup %3137 }
 0xa15   :  { %v3140_v18 = vpop.eup %3139  ;;  %v996_v19 = vmul.f32 %v3138_v16, %v980_v61 }
 0xa16   :  { %v995_v22 = vmul.f32 %v3140_v18, %v979_v12 }
 0xa17   :  { %v1001_v23 = vmul.f32 %v998_v36, %v996_v19 }
 0xa18   :  { %v1000_v29 = vmul.f32 %v998_v36, %v995_v22 }
 0xa19   :  { %v3498_v31 = vadd.f32 %v1003_v24, %v1001_v23 }
 0xa1a   :  { %v3496_v30 = vadd.f32 %v1003_v24, %v1000_v29 }
 0xa1c   :  { %2601 = vmatprep.mubr.msk.f32.mxu0 %vm153_vm0, %v3496_v30 }
 0xa1d   :  { %2602 = vmatmul.mubr.msk.f32.vlgmr.msra.gmra.mrb[8].mxu0 %vm153_vm0, %v3498_v31 }
 0xaf0   :  { %v2603_v41 = vpop.f32.mrb[8].mxu0 }
 0xaf1   :  { %v3507_v42 = vadd.f32 %v2603_v41, %v3504_v32  ;;  %v1094_v35 = vpop.f32.mrb[9].mxu0 }
 0xaf2   :  { %v1095_v37 = vadd.f32 %v3504_v32, %v1094_v35 }
 0xaf3   :  { %v1106_v38 = vmul.f32 %v3507_v42, %v3282_v45  ;;  %v1104_v39 = vmul.f32 %v3507_v42, %v3284_v46  ;;  %v1110_v57 = vmul.f32 %v3507_v42, %v3298_v54  ;;  %v1108_v60 = vmul.f32 %v3507_v42, %v3286_v47 }
 0xaf4   :  { %2620 = vmatprep.mubr.msk.f32.mxu0 %vm153_vm0, %v1095_v37  ;;  %v1105_v52 = vmul.f32 %v1095_v37, %v3278_v43  ;;  %v1103_v56 = vmul.f32 %v1095_v37, %v3280_v44  ;;  %v1109_v53 = vmul.f32 %v1095_v37, %v3300_v55  ;;  %v1107_v45 = vmul.f32 %v1095_v37, %v3288_v48 }
 0xaf5   :  { %v1113_v43 = vmul.f32 %v1095_v37, %v3354_v28  ;;  %v1114_v44 = vmul.f32 %v3507_v42, %v3352_v27  ;;  %v1111_v46 = vmul.f32 %v1095_v37, %v3346_v21  ;;  %v1112_v47 = vmul.f32 %v3507_v42, %v3344_v20 }
 0xaf6   :  { %v3070_v13 = vpack.i.bf16 %v1106_v38, %v1105_v52  ;;  %v3065_v58 = vpack.i.bf16 %v1104_v39, %v1103_v56  ;;  %v3080_v54 = vpack.i.bf16 %v1110_v57, %v1109_v53  ;;  %v3075_v51 = vpack.i.bf16 %v1108_v60, %v1107_v45 }
 0xaf7   :  { %v3090_v48 = vpack.i.bf16 %v1114_v44, %v1113_v43  ;;  %v3085_v55 = vpack.i.bf16 %v1112_v47, %v1111_v46  ;;  %v1117_v59 = vmul.f32 %v1095_v37, %v3376_v50  ;;  %v1118_v28 = vmul.f32 %v3507_v42, %v3374_v40 }
 0xaf8   :  { %3071 = vrot.lane.b32.xlu0 %v3070_v13, %s3209_s27  ;;  %3066 = vrot.lane.b32.xlu1 %v3065_v58, %s3209_s27  ;;  %v1115_v27 = vmul.f32 %v1095_v37, %v3367_v34  ;;  %v1116_v21 = vmul.f32 %v3507_v42, %v3365_v33  ;;  %v3105_v53 = vpack.i.bf16 %v3484_v63, %v3482_v14 }
 0xaf9   :  { %v3100_v20 = vpack.i.bf16 %v1118_v28, %v1117_v59  ;;  %v3110_v45 = vpack.i.bf16 %v3492_v2, %v3490_v1 }
 0xafa   :  { %v3095_v61 = vpack.i.bf16 %v1116_v21, %v1115_v27 }
 0xafc   :  { %3081 = vrot.lane.b32.xlu0 %v3080_v54, %s3209_s27  ;;  %3076 = vrot.lane.b32.xlu1 %v3075_v51, %s3209_s27 }
 0xb00   :  { %3091 = vrot.lane.b32.xlu0 %v3090_v48, %s3210_s28  ;;  %3086 = vrot.lane.b32.xlu1 %v3085_v55, %s3210_s28 }
 0xb04   :  { %3101 = vrot.lane.b32.xlu0 %v3100_v20, %s3210_s28  ;;  %3096 = vrot.lane.b32.xlu1 %v3095_v61, %s3210_s28 }
 0xb08   :  { %3106 = vrot.lane.b32.xlu1 %v3105_v53, %s3208_s26  ;;  %3111 = vrot.lane.b32.xlu0 %v3110_v45, %s3208_s26 }
 0xb0c   :  { %1459 = vrot.lane.b32.xlu1 %v3504_v32, %s3208_s26 }
 0xb6a   :  { %v3072_v12 = vpop.permute.xlu0 %3071  ;;  %v3067_v50 = vpop.permute.xlu1 %3066 }
 0xb6b   :  { %v3074_v3 = vunpack.i.h.bf16 %v3072_v12  ;;  %v3073_v15 = vunpack.i.l.bf16 %v3072_v12  ;;  %v3069_v40 = vunpack.i.h.bf16 %v3067_v50  ;;  %v3068_v49 = vunpack.i.l.bf16 %v3067_v50 }
 0xb6d   :  { %v2881_v34 = vpack.c.bf16 %v3069_v40, %v3068_v49  ;;  %v2887_v0 = vpack.c.bf16 %v3074_v3, %v3073_v15 }
 0xb6e   :  { %v3077_v62 = vpop.permute.xlu1 %3076  ;;  %v3082_v11 = vpop.permute.xlu0 %3081 }
 0xb6f   :  { %2883 = vmatprep.subr.msk.bf16.mxu0 %vm3334_vm1, %v2881_v34  ;;  %v3079_v4 = vunpack.i.h.bf16 %v3077_v62  ;;  %v3078_v5 = vunpack.i.l.bf16 %v3077_v62  ;;  %v3084_v16 = vunpack.i.h.bf16 %v3082_v11  ;;  %v3083_v36 = vunpack.i.l.bf16 %v3082_v11  ;;  %v1012_v11 = vld [vmem:[#allocation2 + $0xf0] sm:$0xff] }
 0xb70   :  { %2886 = vmatpush3.bf16.xpose.msk.msra.mxu0 %vm3334_vm1, %v2881_v34  ;;  %v3581_v34 = vld [vmem:[#allocation2 + $0x109] ss:$0 sm:$0xff] }
 0xb71   :  { %2889 = vmatprep.subr.msk.bf16.mxu0 %vm3334_vm1, %v2887_v0  ;;  %v2893_v9 = vpack.c.bf16 %v3079_v4, %v3078_v5  ;;  %v2899_v18 = vpack.c.bf16 %v3084_v16, %v3083_v36  ;;  %v1013_v36 = vld [vmem:[#allocation2 + $0xf8] sm:$0xff] }
 0xb72   :  { %v3087_v33 = vpop.permute.xlu1 %3086  ;;  %v3092_v35 = vpop.permute.xlu0 %3091 }
 0xb73   :  { %v3089_v6 = vunpack.i.h.bf16 %v3087_v33  ;;  %v3088_v7 = vunpack.i.l.bf16 %v3087_v33  ;;  %v3094_v37 = vunpack.i.h.bf16 %v3092_v35  ;;  %v3093_v38 = vunpack.i.l.bf16 %v3092_v35 }
 0xb75   :  { %v2921_v8 = vpack.c.bf16 %v3089_v6, %v3088_v7  ;;  %v2925_v56 = vpack.c.bf16 %v3094_v37, %v3093_v38 }
 0xb76   :  { %v3097_v39 = vpop.permute.xlu1 %3096 }
 0xb77   :  { %2922 = vmatprep.subr.bf16.mxu1 %v2921_v8  ;;  %v3098_v57 = vunpack.i.l.bf16 %v3097_v39 }
 0xb78   :  { %2892 = vmatpush3.bf16.xpose.msk.msra.mxu0 %vm3334_vm1, %v2887_v0 }
 0xb79   :  { %2895 = vmatprep.subr.msk.bf16.mxu0 %vm3334_vm1, %v2893_v9 }
 0xb7a   :  { %v3107_v46 = vpop.permute.xlu1 %3106 }
 0xb7b   :  { %v3109_v54 = vunpack.i.h.bf16 %v3107_v46  ;;  %v3108_v51 = vunpack.i.l.bf16 %v3107_v46 }
 0xb7d   :  { %v2937_v63 = vpack.c.bf16 %v3109_v54, %v3108_v51  ;;  %v2289_v54 = vld [vmem:[#allocation2 + $0x10a] ss:$0 sm:$0xff] }
 0xb7e   :  { %v1460_v21 = vpop.permute.xlu1 %1459 }
 0xb80   :  { %2898 = vmatpush3.bf16.xpose.msk.msra.mxu0 %vm3334_vm1, %v2893_v9  ;;  %v1011_v9 = vld [vmem:[#allocation2 + $0xe8] sm:$0xff] }
 0xb81   :  { %2901 = vmatprep.subr.msk.bf16.mxu0 %vm3334_vm1, %v2899_v18  ;;  %v2945_v16 = vpack.c.bf16 %v1012_v11, %v1011_v9 }
 0xb88   :  { %2904 = vmatpush3.bf16.xpose.msk.msra.mxu0 %vm3334_vm1, %v2899_v18  ;;  %v1014_v18 = vld [vmem:[#allocation2 + $0x100] sm:$0xff] }
 0xb89   :  { %2938 = vmatprep.subr.bf16.mxu0 %v2937_v63 }
 0xb8f   :  { %2621 = vmatmul.mubr.msk.f32.vlgmr.msra.gmra.mrb[10].mxu0 %vm153_vm0, %v3507_v42  ;;  %v3099_v42 = vunpack.i.h.bf16 %v3097_v39 }
 0xb90   :  { %2940 = vmatpush3.bf16.msra.mxu0 %v2937_v63 }
 0xb91   :  { %v2929_v13 = vpack.c.bf16 %v3099_v42, %v3098_v57 }
 0xc62   :  { %v2622_v19 = vpop.f32.mrb[10].mxu0 }
 0xc63   :  { %v1237_v22 = vadd.f32 %v2622_v19, %v3417_v25  ;;  %v1231_v23 = vpop.f32.mrb[11].mxu0  ;;  %v3102_v25 = vpop.permute.xlu0 %3101  ;;  %v2949_v19 = vpack.c.bf16 %v1014_v18, %v1013_v36 }
 0xc64   :  { %v1232_v24 = vadd.f32 %v1231_v23, %v3422_v26  ;;  %v3104_v26 = vunpack.i.h.bf16 %v3102_v25  ;;  %v3103_v60 = vunpack.i.l.bf16 %v3102_v25  ;;  %v3120_v23 = vpack.i.bf16 %v1014_v18, %v1013_v36 }
 0xc65   :  { %v1242_v29 = vmul.f32 1.442695, %v1237_v22  ;;  %v3115_v22 = vpack.i.bf16 %v1012_v11, %v1011_v9 }
 0xc66   :  { %v1240_v41 = vmul.f32 1.442695, %v1232_v24  ;;  %v2933_v58 = vpack.c.bf16 %v3104_v26, %v3103_v60 }
 0xc67   :  { %v3112_v47 = vpop.permute.xlu0 %3111 }
 0xc68   :  { %3141 = vpow2.f32 %v1240_v41  ;;  %v3114_v48 = vunpack.i.h.bf16 %v3112_v47  ;;  %v3113_v14 = vunpack.i.l.bf16 %v3112_v47 }
 0xc69   :  { %3143 = vpow2.f32 %v1242_v29 }
 0xc6a   :  { %v2941_v55 = vpack.c.bf16 %v3114_v48, %v3113_v14 }
 0xc6c   :  { %2942 = vmatprep.subr.bf16.mxu0 %v2941_v55 }
 0xc6d   :  { %2944 = vmatpush3.bf16.msra.mxu0 %v2941_v55 }
 0xc72   :  { %v3142_v52 = vpop.eup %3141 }
 0xc73   :  { %v3144_v10 = vpop.eup %3143  ;;  %2639 = vmatprep.mubr.msk.f32.mxu1 %vm432_vm2, %v3142_v52 }
 0xc74   :  { %2640 = vmatmul.mubr.msk.f32.vlgmr.msra.gmra.mrb[8].mxu1 %vm432_vm2, %v3144_v10 }
 0xc75   :  { %2924 = vmatpush3.bf16.msra.mxu1 %v2921_v8 }
 0xc76   :  { %2926 = vmatprep.subr.bf16.mxu1 %v2925_v56 }
 0xc79   :  { %2928 = vmatpush3.bf16.msra.mxu1 %v2925_v56 }
 0xc7a   :  { %2930 = vmatprep.subr.bf16.mxu1 %v2929_v13 }
 0xc7d   :  { %2932 = vmatpush3.bf16.msra.mxu1 %v2929_v13 }
 0xc7e   :  { %2934 = vmatprep.subr.bf16.mxu1 %v2933_v58 }
 0xc81   :  { %2936 = vmatpush3.bf16.msra.mxu1 %v2933_v58 }
 0xc82   :  { %2946 = vmatprep.subr.bf16.mxu1 %v2945_v16 }
 0xd47   :  { %v2641_v43 = vpop.f32.mrb[8].mxu1 }
 0xd48   :  { %3145 = vrcp.f32 %v2641_v43  ;;  %v1316_v44 = vpop.f32.mrb[9].mxu1 }
 0xd49   :  { %3147 = vrcp.f32 %v1316_v44 }
 0xd52   :  { %v3146_v1 = vpop.eup %3145 }
 0xd53   :  { %v3148_v2 = vpop.eup %3147  ;;  %v1328_v28 = vmul.f32 %v3146_v1, %v3144_v10 }
 0xd54   :  { %v1327_v59 = vmul.f32 %v3148_v2, %v3142_v52 }
 0xd56   :  { %2658 = vmatprep.mubr.msk.f32.mxu1 %vm432_vm2, %v1327_v59 }
 0xd57   :  { %2659 = vmatmul.mubr.msk.f32.vlgmr.msra.gmra.mrb[10].mxu1 %vm432_vm2, %v1328_v28 }
 0xd58   :  { %2948 = vmatpush3.bf16.msra.mxu1 %v2945_v16 }
 0xd59   :  { %2950 = vmatprep.subr.bf16.mxu1 %v2949_v19 }
 0xd5c   :  { %2952 = vmatpush3.bf16.msra.mxu1 %v2949_v19 }
 0xe2a   :  { %v2660_v32 = vpop.f32.mrb[10].mxu1 }
 0xe2b   :  { %v1433_v27 = vpop.f32.mrb[11].mxu1 }
 0xe2c   :  { %2669 = vmatprep.mubr.msk.f32.mxu0 %vm153_vm0, %v1433_v27 }
 0xe2d   :  { %2670 = vmatmul.mubr.msk.f32.vlgmr.msra.gmra.mrb[12].mxu0 %vm153_vm0, %v2660_v32 }
 0xf00   :  { %v2671_v20 = vpop.f32.mrb[12].mxu0 }
 0xf01   :  { %v1540_v61 = vadd.f32 %v2671_v20, %v1460_v21  ;;  %v1534_v12 = vpop.f32.mrb[13].mxu0 }
 0xf02   :  { %v1535_v50 = vadd.f32 %v1534_v12, %v1460_v21 }
 0xf03   :  { %v1544_v3 = vadd.f32 %v1540_v61, %v3498_v31 }
 0xf04   :  { %v1543_v15 = vadd.f32 %v1535_v50, %v3496_v30 }
 0xf05   :  { %v1548_v40 = vsel %vm153_vm0, %v1544_v3, 0.0 }
 0xf06   :  { %1549 = vadd.xlane.f32.xlu1 %v1548_v40  ;;  %v1545_v49 = vsel %vm153_vm0, %v1543_v15, 0.0 }
 0xf07   :  { %1546 = vadd.xlane.f32.xlu0 %v1545_v49 }
 0xf17   :  { %1578 = vrot.lane.b32.xlu1 %v3581_v34, %s3209_s27 }
 0xf1b   :  { %3121 = vrot.lane.b32.xlu1 %v3120_v23, %s3210_s28 }
 0xf1f   :  { %1687 = vrot.lane.b32.xlu1 %v2289_v54, %s3210_s28 }
 0xf93   :  { %v1550_v62 = vpop.xlane.xlu1 %1549 }
 0xf94   :  { %v1552_v0 = vmul.f32 0.03125, %v1550_v62  ;;  %v1547_v33 = vpop.xlane.xlu0 %1546 }
 0xf95   :  { %v1551_v4 = vmul.f32 0.03125, %v1547_v33 }
 0xf96   :  { %v1554_v5 = vsub.f32 %v1544_v3, %v1552_v0 }
 0xf97   :  { %v1553_v6 = vsub.f32 %v1543_v15, %v1551_v4  ;;  %v1579_v39 = vpop.permute.xlu1 %1578 }
 0xf98   :  { %v1556_v7 = vmul.f32 %v1554_v5, %v1554_v5 }
 0xf99   :  { %v1555_v31 = vmul.f32 %v1553_v6, %v1553_v6 }
 0xf9a   :  { %v1560_v8 = vsel %vm153_vm0, %v1556_v7, 0.0 }
 0xf9b   :  { %v1557_v30 = vsel %vm153_vm0, %v1555_v31, 0.0  ;;  %v3122_v57 = vpop.permute.xlu1 %3121  ;;  %v3211_v31 = vmov 0.0|0.0  }
 0xf9c   :  { %1558 = vadd.xlane.f32.xlu0 %v1557_v30  ;;  %v3124_v26 = vunpack.i.h.bf16 %v3122_v57  ;;  %v3123_v60 = vunpack.i.l.bf16 %v3122_v57  ;;  %2965 = vmatprep.subr.bf16.mxu1 %v3211_v31  ;;  %v3213_v30 = vmov 0.0   ;;  %v1893_v57 = vld [vmem:[#allocation2 + $0x118] sm:$0xff] }
 0xf9e   :  { %v2959_v53 = vpack.c.bf16 %v3124_v26, %v3123_v60  ;;  %v1894_v60 = vld [vmem:[#allocation2 + $0x120] sm:$0xff] }
 0xf9f   :  { %v1688_v28 = vpop.permute.xlu1 %1687 }
 0xfa0   :  { %1561 = vadd.xlane.f32.xlu0 %v1560_v8 }
 0xfb6   :  { %3116 = vrot.lane.b32.xlu0 %v3115_v22, %s3210_s28 }
0x1029   :  { %v1559_v24 = vpop.xlane.xlu0 %1558 }
0x102a   :  { %v1563_v29 = vmul.f32 0.03125, %v1559_v24 }
0x102c   :  { %v1565_v41 = vadd.f32 1e-05, %v1563_v29 }
0x102d   :  { %v1562_v35 = vpop.xlane.xlu0 %1561 }
0x102e   :  { %3149 = vrsqrt.f32 %v1565_v41  ;;  %v1564_v37 = vmul.f32 0.03125, %v1562_v35 }
0x1030   :  { %v1566_v38 = vadd.f32 1e-05, %v1564_v37 }
0x1031   :  { %v3117_v52 = vpop.permute.xlu0 %3116 }
0x1032   :  { %3151 = vrsqrt.f32 %v1566_v38  ;;  %v3119_v56 = vunpack.i.h.bf16 %v3117_v52  ;;  %v3118_v42 = vunpack.i.l.bf16 %v3117_v52  ;;  %v1896_v38 = vld [vmem:[#allocation2 + $0x130] sm:$0xff] }
0x1034   :  { %v2953_v13 = vpack.c.bf16 %v3119_v56, %v3118_v42  ;;  %v1892_v42 = vld [vmem:[#allocation2 + $0x110] sm:$0xff] }
0x1035   :  { %v2972_v26 = vpack.c.bf16 %v1893_v57, %v1892_v42 }
0x1036   :  { %2955 = vmatprep.subr.msk.bf16.mxu0 %vm3449_vm3, %v2953_v13 }
0x1037   :  { %2958 = vmatpush3.bf16.xpose.msk.msra.mxu0 %vm3449_vm3, %v2953_v13  ;;  %v1895_v13 = vld [vmem:[#allocation2 + $0x128] sm:$0xff] }
0x1038   :  { %v3150_v10 = vpop.eup %3149  ;;  %2961 = vmatprep.subr.msk.bf16.mxu0 %vm3449_vm3, %v2959_v53 }
0x1039   :  { %v1569_v25 = vmul.f32 %v3150_v10, %v1553_v6  ;;  %v42_v10 = vld [vmem:[#allocation2 + $0x228] sm:$0x3] }
0x103b   :  { %v1575_v58 = vmul.f32 %v3581_v34, %v1569_v25  ;;  %v1891_v25 = vld [vmem:[%s3645_s0 + $0x20] sm:$0x3]  ;;  %s3214_s0 = smov [#allocation5]  }
0x103c   :  { %v3152_v45 = vpop.eup %3151  ;;  %s2231_s7 = sshll.u32 %s3214_s0, 4  ;;  %s2232_s7 = int_to_ptr.vmem [resolvable:$true] %s2231_s7 }
0x103d   :  { %v1570_v43 = vmul.f32 %v3152_v45, %v1554_v5  ;;  %v1581_v44 = vadd.f32 %v1579_v39, %v1575_v58  ;;  %v2975_v58 = vpack.c.bf16 %v1895_v13, %v1894_v60  ;;  %v2054_v45 = vld [vmem:[#allocation2 + $0x148] sm:$0xff]  ;;  %s3179_s8 = scalar_lea.vmem %s2232_s7, 32  ;;  %p3184_p9 = scmp.lt.s32.totalorder %s2232_s7, %s2232_s7 }
0x103e   :  { %p3180_p8 = scmp.ne.s32.totalorder %s2232_s7, %s3179_s8  ;;  %p3185_p10 = scmp.lt.s32.totalorder %s3179_s8, %s3179_s8 }
0x103f   :  { %v1576_v46 = vmul.f32 %v3581_v34, %v1570_v43  ;;  %2680 = vmatprep.mubr.msk.f32.mxu1 %vm153_vm0, %v1581_v44  ;;  %2964 = vmatpush3.bf16.xpose.msk.msra.mxu0 %vm3449_vm3, %v2959_v53  ;;  %v2053_v53 = vld [vmem:[#allocation2 + $0x140] sm:$0xff] }
0x1040   :  { %2977 = vmatprep.subr.bf16.mxu0 %v3211_v31  ;;  %v2978_v43 = vpack.c.bf16 %v2054_v45, %v2053_v53  ;;  %p3186_p11 = por %p3185_p10, %p3184_p9 }
0x1041   :  { %v1582_v47 = vadd.f32 %v1579_v39, %v1576_v46  ;;  %v1897_v39 = vld [vmem:[#allocation2 + $0x138] sm:$0xff] }
0x1042   :  { %v2969_v56 = vpack.c.bf16 %v1897_v39, %v1896_v38  ;;  %v2056_v46 = vld [vmem:[#allocation2 + $0x158] sm:$0xff]  ;;  %p3187_p12 = pnand %p3186_p11, %p3180_p8 }
0x1043   :  { %2681 = vmatmul.mubr.msk.f32.vlgmr.msra.gmra.mrb[12].mxu1 %vm153_vm0, %v1582_v47 }
0x1044   :  { %2698 = vmatprep.mubr.msk.f32.mxu1 %vm3212_vm8, %v3213_v30 }
0x1116   :  { %v2682_v51 = vpop.f32.mrb[12].mxu1 }
0x1117   :  { %v1665_v48 = vadd.f32 %v2682_v51, %v2289_v54  ;;  %v1659_v14 = vpop.f32.mrb[13].mxu1 }
0x1118   :  { %v1660_v63 = vadd.f32 %v2289_v54, %v1659_v14 }
0x1119   :  { %v1671_v55 = vmul.f32 0.01, %v1665_v48  ;;  %vm1669_vm6 = vcmp.ge.f32.partialorder %v1665_v48, 0.0 }
0x111a   :  { %vm1668_vm7 = vcmp.ge.f32.partialorder %v1660_v63, 0.0  ;;  %v1670_v1 = vmul.f32 0.01, %v1660_v63 }
0x111b   :  { %v1673_v59 = vsel %vm1669_vm6, %v1665_v48, %v1671_v55  ;;  %v2058_v55 = vld [vmem:[#allocation2 + $0x168] sm:$0xff] }
0x111c   :  { %v1672_v2 = vsel %vm1668_vm7, %v1660_v63, %v1670_v1  ;;  %v2057_v63 = vld [vmem:[#allocation2 + $0x160] sm:$0xff] }
0x111d   :  { %2691 = vmatprep.mubr.msk.f32.mxu0 %vm432_vm2, %v1672_v2  ;;  %v2984_v1 = vpack.c.bf16 %v2058_v55, %v2057_v63  ;;  %v2059_v2 = vld [vmem:[#allocation2 + $0x170] sm:$0xff] }
0x111e   :  { %2692 = vmatmul.mubr.msk.f32.vlgmr.msra.gmra.mrb[14].mxu0 %vm432_vm2, %v1673_v59  ;;  %v2060_v59 = vld [vmem:[#allocation2 + $0x178] sm:$0xff] }
0x111f   :  { %2735 = vmatprep.mubr.msk.f32.mxu0 %vm3212_vm8, %v3213_v30  ;;  %2979 = vmatpush3.bf16.msra.mxu0 %v2978_v43 }
0x1120   :  { %2980 = vmatprep.subr.bf16.mxu0 %v3211_v31 }
0x11f1   :  { %v2693_v17 = vpop.f32.mrb[14].mxu0 }
0x11f2   :  { %v1776_v32 = vadd.f32 %v2693_v17, %v1688_v28  ;;  %v1770_v27 = vpop.f32.mrb[15].mxu0  ;;  %v2142_v17 = vld [vmem:[#allocation2 + $0x180] sm:$0xff] }
0x11f3   :  { %v1771_v21 = vadd.f32 %v1770_v27, %v1688_v28  ;;  %v2987_v28 = vpack.c.bf16 %v2060_v59, %v2059_v2 }
0x11f4   :  { %v1780_v20 = vadd.f32 %v1776_v32, %v1582_v47  ;;  %v2143_v32 = vld [vmem:[#allocation2 + $0x188] sm:$0xff] }
0x11f5   :  { %v1779_v61 = vadd.f32 %v1771_v21, %v1581_v44  ;;  %v2055_v44 = vld [vmem:[#allocation2 + $0x150] sm:$0xff]  ;;  %v2990_v27 = vpack.c.bf16 %v2143_v32, %v2142_v17 }
0x11f6   :  { %v1784_v12 = vsel %vm153_vm0, %v1780_v20, 0.0  ;;  %v2981_v47 = vpack.c.bf16 %v2056_v46, %v2055_v44 }
0x11f7   :  { %1785 = vadd.xlane.f32.xlu1 %v1784_v12  ;;  %v1781_v50 = vsel %vm153_vm0, %v1779_v61, 0.0 }
0x11f8   :  { %1782 = vadd.xlane.f32.xlu0 %v1781_v50  ;;  %2982 = vmatpush3.bf16.msra.mxu0 %v2981_v47 }
0x11f9   :  { %2983 = vmatprep.subr.bf16.mxu0 %v3211_v31 }
0x11fc   :  { %2985 = vmatpush3.bf16.msra.mxu0 %v2984_v1 }
0x11fd   :  { %2986 = vmatprep.subr.bf16.mxu0 %v3211_v31 }
0x1200   :  { %2988 = vmatpush3.bf16.msra.mxu0 %v2987_v28 }
0x1208   :  { %1807 = vrot.lane.b32.xlu1 %v3581_v34, %s3210_s28 }
0x1284   :  { %v1786_v3 = vpop.xlane.xlu1 %1785 }
0x1285   :  { %v1788_v15 = vmul.f32 0.03125, %v1786_v3  ;;  %v1783_v40 = vpop.xlane.xlu0 %1782 }
0x1286   :  { %v1787_v49 = vmul.f32 0.03125, %v1783_v40  ;;  %v2144_v40 = vld [vmem:[#allocation2 + $0x190] sm:$0xff] }
0x1287   :  { %v1790_v62 = vsub.f32 %v1780_v20, %v1788_v15  ;;  %v2301_v20 = vld [vmem:[#allocation2 + $0x1a0] ss:$0 sm:$0xff] }
0x1288   :  { %v1789_v0 = vsub.f32 %v1779_v61, %v1787_v49  ;;  %v1808_v19 = vpop.permute.xlu1 %1807  ;;  %v2145_v49 = vld [vmem:[#allocation2 + $0x198] sm:$0xff] }
0x1289   :  { %v1792_v5 = vmul.f32 %v1790_v62, %v1790_v62 }
0x128a   :  { %v1791_v33 = vmul.f32 %v1789_v0, %v1789_v0 }
0x128b   :  { %v1796_v6 = vsel %vm153_vm0, %v1792_v5, 0.0 }
0x128c   :  { %v1793_v4 = vsel %vm153_vm0, %v1791_v33, 0.0 }
0x128d   :  { %1794 = vadd.xlane.f32.xlu0 %v1793_v4 }
0x1291   :  { %1797 = vadd.xlane.f32.xlu0 %v1796_v6 }
0x12a7   :  { %1812 = vrot.lane.b32.xlu0 %v3581_v34, %s3208_s26 }
0x131a   :  { %v1795_v7 = vpop.xlane.xlu0 %1794 }
0x131b   :  { %v1799_v8 = vmul.f32 0.03125, %v1795_v7 }
0x131d   :  { %v1801_v9 = vadd.f32 1e-05, %v1799_v8 }
0x131e   :  { %v1798_v11 = vpop.xlane.xlu0 %1797 }
0x131f   :  { %3153 = vrsqrt.f32 %v1801_v9  ;;  %v1800_v16 = vmul.f32 0.03125, %v1798_v11 }
0x1321   :  { %v1802_v36 = vadd.f32 1e-05, %v1800_v16 }
0x1322   :  { %v1813_v29 = vpop.permute.xlu0 %1812 }
0x1323   :  { %3155 = vrsqrt.f32 %v1802_v36 }
0x1329   :  { %v3154_v34 = vpop.eup %3153 }
0x132a   :  { %v1805_v18 = vmul.f32 %v3154_v34, %v1789_v0  ;;  %v2302_v0 = vld [vmem:[#allocation2 + $0x1a1] ss:$0 sm:$0xff] }
0x132c   :  { %v1810_v24 = vmul.f32 %v1808_v19, %v1805_v18 }
0x132d   :  { %v3156_v22 = vpop.eup %3155 }
0x132e   :  { %v1806_v23 = vmul.f32 %v3156_v22, %v1790_v62  ;;  %v1815_v35 = vadd.f32 %v1813_v29, %v1810_v24  ;;  %v2993_v62 = vpack.c.bf16 %v2145_v49, %v2144_v40 }
0x1330   :  { %v1811_v41 = vmul.f32 %v1808_v19, %v1806_v23 }
0x1332   :  { %v1816_v37 = vadd.f32 %v1813_v29, %v1811_v41 }
0x1334   :  { %v2966_v52 = vpack.c.bf16 %v1816_v37, %v1815_v35 }
0x1336   :  { %2967 = vmatpush3.bf16.msra.mxu1 %v2966_v52 }
0x1337   :  { %2968 = vmatprep.subr.bf16.mxu1 %v3211_v31 }
0x1339   :  { %2699 = vmatmul.mubr.msk.f32.vlgmr.msra.gmra.mrb[14].mxu1 %vm1817_vm9, %v42_v10 }
0x133a   :  { %2970 = vmatpush3.bf16.msra.mxu1 %v2969_v56  ;;  %2705 = vmatprep.mubr.msk.f32.mxu1 %vm3212_vm8, %v3213_v30 }
0x133b   :  { %2971 = vmatprep.subr.bf16.mxu1 %v3211_v31 }
0x133d   :  { %2706 = vmatmul.mubr.msk.f32.vlgmr.msra.gmra.mrb[16].mxu1 %vm1817_vm9, %v1891_v25 }
0x133e   :  { %2973 = vmatpush3.bf16.msra.mxu1 %v2972_v26  ;;  %2716 = vmatprep.mubr.msk.f32.mxu1 %vm3212_vm8, %v3213_v30 }
0x133f   :  { %2974 = vmatprep.subr.bf16.mxu1 %v3211_v31 }
0x1342   :  { %2976 = vmatpush3.bf16.msra.mxu1 %v2975_v58 }
0x1343   :  { %2989 = vmatprep.subr.bf16.mxu1 %v3211_v31 }
0x140c   :  { %v1887_v54 = vpop.f32.mrb[14].mxu1 }
0x140d   :  { %v2700_v51 = vpop.f32.mrb[15].mxu1  ;;  %2717 = vmatmul.mubr.msk.f32.vlgmr.msra.gmra.mrb[18].mxu1 %vm153_vm0, %v1887_v54 }
0x140e   :  { %2746 = vmatprep.mubr.msk.f32.mxu1 %vm3212_vm8, %v3213_v30  ;;  %2991 = vmatpush3.bf16.msra.mxu1 %v2990_v27  ;;  %v2304_v30 = vld [vmem:[#allocation2 + $0x1a2] ss:$0 sm:$0xff] }
0x140f   :  { %2992 = vmatprep.subr.bf16.mxu1 %v3211_v31 }
0x1410   :  { %v1967_v48 = vpop.f32.mrb[16].mxu1 }
0x1411   :  { %v2707_v14 = vpop.f32.mrb[17].mxu1 }
0x1412   :  { %2994 = vmatpush3.bf16.msra.mxu1 %v2993_v62 }
0x14e0   :  { %v2040_v21 = vpop.f32.mrb[18].mxu1 }
0x14e1   :  { %v2041_v61 = vadd.f32 %v2040_v21, %v1967_v48  ;;  %v2718_v12 = vpop.f32.mrb[19].mxu1 }
0x14e3   :  { %v2049_v50 = vadd.f32 %v2301_v20, %v2041_v61 }
0x14e5   :  { %vm2050_vm10 = vcmp.ge.f32.partialorder %v2049_v50, 0.0  ;;  %v2051_v3 = vmul.f32 0.01, %v2049_v50 }
0x14e7   :  { %v2052_v15 = vsel %vm2050_vm10, %v2049_v50, %v2051_v3 }
0x14e8   :  { %2736 = vmatmul.mubr.msk.f32.vlgmr.msra.gmra.mrb[16].mxu0 %vm432_vm2, %v2052_v15 }
0x15bb   :  { %v2135_v33 = vpop.f32.mrb[16].mxu0 }
0x15bc   :  { %v2136_v4 = vadd.f32 %v2302_v0, %v2135_v33  ;;  %v2737_v5 = vpop.f32.mrb[17].mxu0 }
0x15be   :  { %vm2139_vm11 = vcmp.ge.f32.partialorder %v2136_v4, 0.0  ;;  %v2140_v6 = vmul.f32 0.01, %v2136_v4 }
0x15c0   :  { %v2141_v31 = vsel %vm2139_vm11, %v2136_v4, %v2140_v6 }
0x15c1   :  { %2747 = vmatmul.mubr.msk.f32.vlgmr.msra.gmra.mrb[20].mxu1 %vm153_vm0, %v2141_v31 }
0x1694   :  { %v2220_v7 = vpop.f32.mrb[20].mxu1 }
0x1695   :  { %v2221_v8 = vadd.f32 %v2304_v30, %v2220_v7  ;;  %v2748_v9 = vpop.f32.mrb[21].mxu1 }
0x1697   :  { %2224 = vst [vmem:[#allocation5] sm:$0x3] %v2221_v8 }
0x1698   :  { %3190 = shalt.err (!%p3187_p12)
}
0x1699   :  { %s3191_s11 = scalar_lea.hbm %s3647_s2, 32 }
0x169a   :  { %p3192_p13 = scmp.ne.s32.totalorder %s3647_s2, %s3191_s11  ;;  %p3195_p0 = scmp.lt.u32.totalorder %s3191_s11, %s3647_s2 }
0x169c   :  { %p3197_p1 = pnand %p3195_p0, %p3192_p13 }
0x169e   :  { %3200 = shalt.err (!%p3197_p1)
}
0x169f   :  { %2234 = dma.vmem_to_hbm [thread:$0]  %s2232_s7, 32, %s3647_s2, [#allocation4]  }
0x16a0   :  { %3203 = dma.done.wait [#allocation4], 32  }
0x16a1   :  { %3204 = vsyncadd [#allocation4], 4294967264 }
0x16a2   :  { %2238 = vsyncpa [#allocation3], 1 }
0x16a3   :  { %2239 = vsyncpa [#allocation4], 1 }

</bundles_post_ra>
